<compile_context>
chip_gen: v6e
topology: v6e:2x2x1
jax: 0.10.0
libtpu: 0.0.40
codegen_flags: <defaults>
</compile_context>

<pallas_src>
import functools

import jax
import jax.numpy as jnp
import numpy as np
from jax import lax
from jax.experimental import pallas as pl
from jax.experimental.pallas import tpu as pltpu


def _round_up(v, m):
    return (v + m - 1) // m * m


# ----------------------------- Pallas kernel --------------------------------
def _transnet21_kernel(
    x_ref,     # (1, T*TB, D) bf16  batch-tile input, time-major rows (row = t*TB + b)
    wc_ref,    # (D, 3D) bf16       fused conv taps [W_prev | W_center | W_next]
    cb_ref,    # (1, D)  f32        conv bias
    wih_ref,   # (D, 3H) bf16       GRU input weights  [r | z | n]  (W_ih^T)
    bih_ref,   # (1, 3H) f32        fused bias: b_ih + [b_hr | b_hz | 0]
    whh_ref,   # (H, 3H) bf16       GRU hidden weights (W_hh^T)
    bhn_ref,   # (1, H)  f32        b_hn (must stay inside the reset gate)
    fw_ref,    # (H, Cpad) f32      classifier weight (lane-padded to 128)
    fb_ref,    # (1, Cpad) f32      classifier bias   (lane-padded to 128)
    o_ref,     # (1, TB, Cpad)      output block
    g_ref,     # VMEM scratch (T*TB, 3H) f32: precomputed input-side gates
    *, seq_len, batch_tile,
):
    T, TB = seq_len, batch_tile
    N = T * TB
    D = x_ref.shape[2]
    H = whh_ref.shape[0]

    xf = x_ref[0]                                                      # (N, D) bf16

    # ---- Conv1d(k=3, pad=1) + ReLU: one fused matmul + output-side row shifts ----
    p = jnp.dot(xf, wc_ref[...], preferred_element_type=jnp.float32)   # (N, 3D)
    pm = p[:, 0:D]            # x[t] @ W_prev   -> contributes to y[t+1]
    p0 = p[:, D:2 * D]        # x[t] @ W_center -> contributes to y[t]
    pp = p[:, 2 * D:3 * D]    # x[t] @ W_next   -> contributes to y[t-1]
    zblk = jnp.zeros((TB, D), jnp.float32)
    prev_t = jnp.concatenate([zblk, pm[0:N - TB, :]], axis=0)          # shift by +TB
    next_t = jnp.concatenate([pp[TB:N, :], zblk], axis=0)              # shift by -TB
    y = jnp.maximum(prev_t + p0 + next_t + cb_ref[...], 0.0)           # (N, D) relu

    # ---- GRU input-side gates for all timesteps in a single matmul ----
    # (b_ih and the r/z components of b_hh are pre-fused into bih_ref.)
    g_ref[...] = (jnp.dot(y.astype(jnp.bfloat16), wih_ref[...],
                          preferred_element_type=jnp.float32) + bih_ref[...])
    # TODO(synk): at v7x-scale T/TB store g_ref in bf16 to halve the scratch VMEM.

    # ---- Sequential GRU recurrence (bf16 matmul, f32 state), unrolled over T ----
    whh = whh_ref[...]                                                 # bf16
    bhn = jnp.broadcast_to(bhn_ref[...], (TB, H))                      # hoisted once
    h = jnp.zeros((TB, H), jnp.float32)
    for t in range(T):                                 # fully unrolled (T is small)
        g = g_ref[pl.ds(t * TB, TB), :]                                # (TB, 3H)
        hg = jnp.dot(h.astype(jnp.bfloat16), whh,
                     preferred_element_type=jnp.float32)               # (TB, 3H)
        rz = jax.nn.sigmoid(g[:, 0:2 * H] + hg[:, 0:2 * H])            # fused r,z
        r = rz[:, 0:H]
        z = rz[:, H:2 * H]
        n = jnp.tanh(g[:, 2 * H:3 * H] + r * (hg[:, 2 * H:3 * H] + bhn))
        h = (1.0 - z) * n + z * h

    # ---- Final classifier (lane-dense padded output block) ----
    o_ref[0] = (jnp.dot(h, fw_ref[...], preferred_element_type=jnp.float32)
                + fb_ref[...])


# ------------------------------ wrapper --------------------------------------
@jax.jit
def transnetwork21_forward(x, params):
    """x: [B, T, D] f32. Returns [B, C] f32 (C = num classes)."""
    B, T, D = x.shape
    H = params["whh"].shape[0]
    C = params["fw"].shape[1]

    # Batch tile: multiple of 16 (bf16 sublane packing), capped at 128 MXU rows so the
    # per-step (TB, 3H) f32 recurrence intermediates stay near the 64-vreg budget.
    TB = min(_round_up(B, 16), 128)
    # v7x megacore: prefer >= 2 grid tiles when B allows so both TensorCores get work.
    if B > 16 and pl.cdiv(B, TB) < 2:
        TB = max(16, _round_up(pl.cdiv(B, 2), 16))
    n_tiles = pl.cdiv(B, TB)
    Bpad = n_tiles * TB
    Cpad = _round_up(C, 128)                 # lane-dense output

    # Pad batch, group into tiles, lay out time-major (row = t*TB + b), cast to bf16
    # (kernel consumes it in bf16 anyway -> half the HBM->VMEM DMA bytes).
    # TODO(synk): at large B*T*D do the conv batch-major in-kernel instead of this
    # wrapper transpose (extra HBM pass); irrelevant at these sizes.
    xp = jnp.pad(x, ((0, Bpad - B), (0, 0), (0, 0)))
    xg = (xp.reshape(n_tiles, TB, T, D)
            .transpose(0, 2, 1, 3)
            .reshape(n_tiles, T * TB, D)).astype(jnp.bfloat16)

    # Fuse the 3 conv taps into one (D, 3D) RHS; big-matmul + recurrence weights bf16.
    wconv = jnp.concatenate([params["wm"], params["w0"], params["wp"]],
                            axis=1).astype(jnp.bfloat16)
    wih = params["wih"].astype(jnp.bfloat16)
    whh = params["whh"].astype(jnp.bfloat16)

    # Fold the r/z components of b_hh into b_ih (legal: only b_hn must stay inside
    # the reset gate); pass b_hn separately.
    bih = params["bih"] + jnp.pad(params["bhh"][:, :2 * H], ((0, 0), (0, H)))
    bhn = params["bhh"][:, 2 * H:3 * H]

    # Pad classifier to a full 128-lane output block (unmasked stores).
    fw = jnp.pad(params["fw"], ((0, 0), (0, Cpad - C)))
    fb = jnp.pad(params["fb"], ((0, 0), (0, Cpad - C)))

    const2d = lambda shape: pl.BlockSpec(shape, lambda g: (0, 0))
    kernel = functools.partial(_transnet21_kernel, seq_len=T, batch_tile=TB)

    out = pl.pallas_call(
        kernel,
        out_shape=jax.ShapeDtypeStruct((n_tiles, TB, Cpad), jnp.float32),
        grid=(n_tiles,),
        in_specs=[
            pl.BlockSpec((1, T * TB, D), lambda g: (g, 0, 0)),  # x batch tile (bf16)
            const2d((D, 3 * D)),                                # fused conv taps
            const2d((1, D)),                                    # conv bias
            const2d((D, 3 * H)),                                # GRU W_ih^T (bf16)
            const2d((1, 3 * H)),                                # fused b_ih (+b_hr,b_hz)
            const2d((H, 3 * H)),                                # GRU W_hh^T (bf16)
            const2d((1, H)),                                    # b_hn
            const2d((H, Cpad)),                                 # fc W (padded)
            const2d((1, Cpad)),                                 # fc b (padded)
        ],
        out_specs=pl.BlockSpec((1, TB, Cpad), lambda g: (g, 0, 0)),
        scratch_shapes=[pltpu.VMEM((T * TB, 3 * H), jnp.float32)],
        compiler_params=pltpu.CompilerParams(
            dimension_semantics=("parallel",)),
    )(xg, wconv, params["cb"], wih, bih, whh, bhn, fw, fb)

    return out.reshape(Bpad, Cpad)[:B, :C]


# --------------------------- pure-JAX reference ------------------------------
def reference_forward(x, params):
    """Reference for TransNetwork21.forward (eval). Mirrors the kernel's mixed
    precision: conv / gate / recurrence matmul operands rounded to bf16, f32
    accumulation; h-state, nonlinearities and classifier in f32."""
    f32 = jnp.float32
    bf = lambda a: a.astype(jnp.bfloat16).astype(f32)
    B, T, D = x.shape
    H = params["whh"].shape[0]

    xb = bf(x)
    x_prev = jnp.pad(xb, ((0, 0), (1, 0), (0, 0)))[:, :-1, :]
    x_next = jnp.pad(xb, ((0, 0), (0, 1), (0, 0)))[:, 1:, :]
    y = (x_prev @ bf(params["wm"]) + xb @ bf(params["w0"])
         + x_next @ bf(params["wp"]) + params["cb"])
    y = jnp.maximum(y, 0.0)

    gates = bf(y) @ bf(params["wih"]) + params["bih"]            # (B, T, 3H)
    bhh = params["bhh"]

    def step(h, g_t):
        hg = bf(h) @ bf(params["whh"])
        r = jax.nn.sigmoid(g_t[:, 0:H] + hg[:, 0:H] + bhh[:, 0:H])
        z = jax.nn.sigmoid(g_t[:, H:2 * H] + hg[:, H:2 * H] + bhh[:, H:2 * H])
        n = jnp.tanh(g_t[:, 2 * H:3 * H]
                     + r * (hg[:, 2 * H:3 * H] + bhh[:, 2 * H:3 * H]))
        return (1.0 - z) * n + z * h, None

    h, _ = lax.scan(step, jnp.zeros((B, H), f32), jnp.swapaxes(gates, 0, 1))
    return h @ params["fw"] + params["fb"]


# ------------------------------- main -----------------------------------------
if __name__ == "__main__":
    # Small synthetic instantiation: cnn channels == gru input_size == D,
    # gru hidden_size == H, NUM_TAGS == C.
    B, T, D, H, C = 2, 8, 128, 128, 32

    key = jax.random.PRNGKey(0)
    ks = jax.random.split(key, 11)
    s = 0.05
    params = {
        "wm": jax.random.normal(ks[0], (D, D), jnp.float32) * s,   # conv tap x[t-1]
        "w0": jax.random.normal(ks[1], (D, D), jnp.float32) * s,   # conv tap x[t]
        "wp": jax.random.normal(ks[2], (D, D), jnp.float32) * s,   # conv tap x[t+1]
        "cb": jax.random.normal(ks[3], (1, D), jnp.float32) * s,
        "wih": jax.random.normal(ks[4], (D, 3 * H), jnp.float32) * s,
        "bih": jax.random.normal(ks[5], (1, 3 * H), jnp.float32) * s,
        "whh": jax.random.normal(ks[6], (H, 3 * H), jnp.float32) * s,
        "bhh": jax.random.normal(ks[7], (1, 3 * H), jnp.float32) * s,
        "fw": jax.random.normal(ks[8], (H, C), jnp.float32) * s,
        "fb": jax.random.normal(ks[9], (1, C), jnp.float32) * s,
    }

    x = jax.random.normal(ks[10], (B, T, D), jnp.float32)

    out = transnetwork21_forward(x, params)
    out = jax.block_until_ready(out)

    ref = reference_forward(x, params)
    np.testing.assert_allclose(np.asarray(out), np.asarray(ref),
                               rtol=1e-2, atol=1e-2)

    assert out.shape == (B, C)
    print("KERNEL_OK")
</pallas_src>

<mosaic_0001>
module attributes {stable_mosaic.version = 11 : i64} {
  func.func @_transnet21_kernel(%arg0: i32, %arg1: memref<1x128x128xbf16, #tpu.memory_space<vmem>>, %arg2: memref<128x384xbf16, #tpu.memory_space<vmem>>, %arg3: memref<1x128xf32, #tpu.memory_space<vmem>>, %arg4: memref<128x384xbf16, #tpu.memory_space<vmem>>, %arg5: memref<1x384xf32, #tpu.memory_space<vmem>>, %arg6: memref<128x384xbf16, #tpu.memory_space<vmem>>, %arg7: memref<1x128xf32, #tpu.memory_space<vmem>>, %arg8: memref<128x128xf32, #tpu.memory_space<vmem>>, %arg9: memref<1x128xf32, #tpu.memory_space<vmem>>, %arg10: memref<1x16x128xf32, #tpu.memory_space<vmem>>, %arg11: memref<128x384xf32, #tpu.memory_space<vmem>>) attributes {dimension_semantics = [#tpu.dimension_semantics<parallel>], iteration_bounds = array<i64: 1>, scalar_prefetch = 0 : i64, scratch_operands = 1 : i64, tpu.core_type = #tpu.core_type<tc>, window_params = [{transform_indices = @transform_0, window_bounds = array<i64: 1, 128, 128>}, {pipeline_mode = #tpu.pipeline_mode<synchronous>, transform_indices = @transform_1, window_bounds = array<i64: 128, 384>}, {pipeline_mode = #tpu.pipeline_mode<synchronous>, transform_indices = @transform_2, window_bounds = array<i64: 1, 128>}, {pipeline_mode = #tpu.pipeline_mode<synchronous>, transform_indices = @transform_3, window_bounds = array<i64: 128, 384>}, {pipeline_mode = #tpu.pipeline_mode<synchronous>, transform_indices = @transform_4, window_bounds = array<i64: 1, 384>}, {pipeline_mode = #tpu.pipeline_mode<synchronous>, transform_indices = @transform_5, window_bounds = array<i64: 128, 384>}, {pipeline_mode = #tpu.pipeline_mode<synchronous>, transform_indices = @transform_6, window_bounds = array<i64: 1, 128>}, {pipeline_mode = #tpu.pipeline_mode<synchronous>, transform_indices = @transform_7, window_bounds = array<i64: 128, 128>}, {pipeline_mode = #tpu.pipeline_mode<synchronous>, transform_indices = @transform_8, window_bounds = array<i64: 1, 128>}, {transform_indices = @transform_9, window_bounds = array<i64: 1, 16, 128>}]} {
    %c0 = arith.constant 0 : index
    %c0_0 = arith.constant 0 : index
    %c0_1 = arith.constant 0 : index
    %0 = vector.load %arg1[%c0, %c0_0, %c0_1] : memref<1x128x128xbf16, #tpu.memory_space<vmem>>, vector<1x128x128xbf16>
    %1 = vector.shape_cast %0 : vector<1x128x128xbf16> to vector<128x128xbf16>
    %c0_2 = arith.constant 0 : index
    %c0_3 = arith.constant 0 : index
    %2 = vector.load %arg2[%c0_2, %c0_3] : memref<128x384xbf16, #tpu.memory_space<vmem>>, vector<128x384xbf16>
    %cst = arith.constant dense<0.000000e+00> : vector<128x384xf32>
    %3 = tpu.matmul %1, %2, %cst {dimension_numbers = #tpu.dot_dimension_numbers<[1], [0], [0], [1], [0, 0, 1, 1], [], []>} : vector<128x128xbf16>, vector<128x384xbf16>, vector<128x384xf32> -> vector<128x384xf32>
    %4 = vector.extract_strided_slice %3 {offsets = [0, 0], sizes = [128, 128], strides = [1, 1]} : vector<128x384xf32> to vector<128x128xf32>
    %5 = vector.extract_strided_slice %3 {offsets = [0, 128], sizes = [128, 128], strides = [1, 1]} : vector<128x384xf32> to vector<128x128xf32>
    %6 = vector.extract_strided_slice %3 {offsets = [0, 256], sizes = [128, 128], strides = [1, 1]} : vector<128x384xf32> to vector<128x128xf32>
    %cst_4 = arith.constant 0.000000e+00 : f32
    %7 = vector.broadcast %cst_4 : f32 to vector<16x128xf32>
    %8 = vector.extract_strided_slice %4 {offsets = [0, 0], sizes = [112, 128], strides = [1, 1]} : vector<128x128xf32> to vector<112x128xf32>
    %9 = tpu.concatenate %7, %8 in 0 : vector<16x128xf32>, vector<112x128xf32> -> vector<128x128xf32>
    %10 = vector.extract_strided_slice %6 {offsets = [16, 0], sizes = [112, 128], strides = [1, 1]} : vector<128x128xf32> to vector<112x128xf32>
    %11 = tpu.concatenate %10, %7 in 0 : vector<112x128xf32>, vector<16x128xf32> -> vector<128x128xf32>
    %12 = arith.addf %9, %5 : vector<128x128xf32>
    %13 = arith.addf %12, %11 : vector<128x128xf32>
    %c0_5 = arith.constant 0 : index
    %c0_6 = arith.constant 0 : index
    %14 = vector.load %arg3[%c0_5, %c0_6] : memref<1x128xf32, #tpu.memory_space<vmem>>, vector<1x128xf32>
    %15 = vector.broadcast %14 : vector<1x128xf32> to vector<128x128xf32>
    %16 = arith.addf %13, %15 : vector<128x128xf32>
    %cst_7 = arith.constant 0.000000e+00 : f32
    %17 = vector.broadcast %cst_7 : f32 to vector<128x128xf32>
    %18 = arith.maximumf %16, %17 : vector<128x128xf32>
    %19 = arith.truncf %18 : vector<128x128xf32> to vector<128x128xbf16>
    %c0_8 = arith.constant 0 : index
    %c0_9 = arith.constant 0 : index
    %20 = vector.load %arg4[%c0_8, %c0_9] : memref<128x384xbf16, #tpu.memory_space<vmem>>, vector<128x384xbf16>
    %cst_10 = arith.constant dense<0.000000e+00> : vector<128x384xf32>
    %21 = tpu.matmul %19, %20, %cst_10 {dimension_numbers = #tpu.dot_dimension_numbers<[1], [0], [0], [1], [0, 0, 1, 1], [], []>} : vector<128x128xbf16>, vector<128x384xbf16>, vector<128x384xf32> -> vector<128x384xf32>
    %c0_11 = arith.constant 0 : index
    %c0_12 = arith.constant 0 : index
    %22 = vector.load %arg5[%c0_11, %c0_12] : memref<1x384xf32, #tpu.memory_space<vmem>>, vector<1x384xf32>
    %23 = vector.broadcast %22 : vector<1x384xf32> to vector<128x384xf32>
    %24 = arith.addf %21, %23 : vector<128x384xf32>
    %c0_13 = arith.constant 0 : index
    %c0_14 = arith.constant 0 : index
    %25 = vector.load %arg11[%c0_13, %c0_14] : memref<128x384xf32, #tpu.memory_space<vmem>>, vector<128x384xf32>
    tpu.vector_store %arg11[%c0_13, %c0_14], %24 {strides = array<i32>} : memref<128x384xf32, #tpu.memory_space<vmem>>, vector<128x384xf32>,
    %c0_15 = arith.constant 0 : index
    %c0_16 = arith.constant 0 : index
    %26 = vector.load %arg6[%c0_15, %c0_16] : memref<128x384xbf16, #tpu.memory_space<vmem>>, vector<128x384xbf16>
    %c0_17 = arith.constant 0 : index
    %c0_18 = arith.constant 0 : index
    %27 = vector.load %arg7[%c0_17, %c0_18] : memref<1x128xf32, #tpu.memory_space<vmem>>, vector<1x128xf32>
    %28 = vector.shape_cast %27 : vector<1x128xf32> to vector<1x128xf32>
    %29 = vector.broadcast %28 : vector<1x128xf32> to vector<16x128xf32>
    %cst_19 = arith.constant 0.000000e+00 : f32
    %30 = vector.broadcast %cst_19 : f32 to vector<16x128xf32>
    %c0_20 = arith.constant 0 : index
    %c0_21 = arith.constant 0 : index
    %31 = vector.load %arg11[%c0_20, %c0_21] : memref<128x384xf32, #tpu.memory_space<vmem>>, vector<16x384xf32>
    %32 = arith.truncf %30 : vector<16x128xf32> to vector<16x128xbf16>
    %cst_22 = arith.constant dense<0.000000e+00> : vector<16x384xf32>
    %33 = tpu.matmul %32, %26, %cst_22 {dimension_numbers = #tpu.dot_dimension_numbers<[1], [0], [0], [1], [0, 0, 1, 1], [], []>} : vector<16x128xbf16>, vector<128x384xbf16>, vector<16x384xf32> -> vector<16x384xf32>
    %34 = vector.extract_strided_slice %31 {offsets = [0, 0], sizes = [16, 256], strides = [1, 1]} : vector<16x384xf32> to vector<16x256xf32>
    %35 = vector.extract_strided_slice %33 {offsets = [0, 0], sizes = [16, 256], strides = [1, 1]} : vector<16x384xf32> to vector<16x256xf32>
    %36 = arith.addf %34, %35 : vector<16x256xf32>
    %37 = arith.negf %36 : vector<16x256xf32>
    %38 = math.exp %37 : vector<16x256xf32>
    %cst_23 = arith.constant 1.000000e+00 : f32
    %39 = vector.broadcast %cst_23 : f32 to vector<16x256xf32>
    %40 = arith.addf %39, %38 : vector<16x256xf32>
    %41 = arith.divf %39, %40 : vector<16x256xf32>
    %42 = vector.extract_strided_slice %41 {offsets = [0, 0], sizes = [16, 128], strides = [1, 1]} : vector<16x256xf32> to vector<16x128xf32>
    %43 = vector.extract_strided_slice %41 {offsets = [0, 128], sizes = [16, 128], strides = [1, 1]} : vector<16x256xf32> to vector<16x128xf32>
    %44 = vector.extract_strided_slice %31 {offsets = [0, 256], sizes = [16, 128], strides = [1, 1]} : vector<16x384xf32> to vector<16x128xf32>
    %45 = vector.extract_strided_slice %33 {offsets = [0, 256], sizes = [16, 128], strides = [1, 1]} : vector<16x384xf32> to vector<16x128xf32>
    %46 = arith.addf %45, %29 : vector<16x128xf32>
    %47 = arith.mulf %42, %46 : vector<16x128xf32>
    %48 = arith.addf %44, %47 : vector<16x128xf32>
    %49 = math.tanh %48 : vector<16x128xf32>
    %cst_24 = arith.constant 1.000000e+00 : f32
    %50 = vector.broadcast %cst_24 : f32 to vector<16x128xf32>
    %51 = arith.subf %50, %43 : vector<16x128xf32>
    %52 = arith.mulf %51, %49 : vector<16x128xf32>
    %53 = arith.mulf %43, %30 : vector<16x128xf32>
    %54 = arith.addf %52, %53 : vector<16x128xf32>
    %c16 = arith.constant 16 : index
    %c0_25 = arith.constant 0 : index
    %55 = vector.load %arg11[%c16, %c0_25] : memref<128x384xf32, #tpu.memory_space<vmem>>, vector<16x384xf32>
    %56 = arith.truncf %54 : vector<16x128xf32> to vector<16x128xbf16>
    %cst_26 = arith.constant dense<0.000000e+00> : vector<16x384xf32>
    %57 = tpu.matmul %56, %26, %cst_26 {dimension_numbers = #tpu.dot_dimension_numbers<[1], [0], [0], [1], [0, 0, 1, 1], [], []>} : vector<16x128xbf16>, vector<128x384xbf16>, vector<16x384xf32> -> vector<16x384xf32>
    %58 = vector.extract_strided_slice %55 {offsets = [0, 0], sizes = [16, 256], strides = [1, 1]} : vector<16x384xf32> to vector<16x256xf32>
    %59 = vector.extract_strided_slice %57 {offsets = [0, 0], sizes = [16, 256], strides = [1, 1]} : vector<16x384xf32> to vector<16x256xf32>
    %60 = arith.addf %58, %59 : vector<16x256xf32>
    %61 = arith.negf %60 : vector<16x256xf32>
    %62 = math.exp %61 : vector<16x256xf32>
    %cst_27 = arith.constant 1.000000e+00 : f32
    %63 = vector.broadcast %cst_27 : f32 to vector<16x256xf32>
    %64 = arith.addf %63, %62 : vector<16x256xf32>
    %65 = arith.divf %63, %64 : vector<16x256xf32>
    %66 = vector.extract_strided_slice %65 {offsets = [0, 0], sizes = [16, 128], strides = [1, 1]} : vector<16x256xf32> to vector<16x128xf32>
    %67 = vector.extract_strided_slice %65 {offsets = [0, 128], sizes = [16, 128], strides = [1, 1]} : vector<16x256xf32> to vector<16x128xf32>
    %68 = vector.extract_strided_slice %55 {offsets = [0, 256], sizes = [16, 128], strides = [1, 1]} : vector<16x384xf32> to vector<16x128xf32>
    %69 = vector.extract_strided_slice %57 {offsets = [0, 256], sizes = [16, 128], strides = [1, 1]} : vector<16x384xf32> to vector<16x128xf32>
    %70 = arith.addf %69, %29 : vector<16x128xf32>
    %71 = arith.mulf %66, %70 : vector<16x128xf32>
    %72 = arith.addf %68, %71 : vector<16x128xf32>
    %73 = math.tanh %72 : vector<16x128xf32>
    %cst_28 = arith.constant 1.000000e+00 : f32
    %74 = vector.broadcast %cst_28 : f32 to vector<16x128xf32>
    %75 = arith.subf %74, %67 : vector<16x128xf32>
    %76 = arith.mulf %75, %73 : vector<16x128xf32>
    %77 = arith.mulf %67, %54 : vector<16x128xf32>
    %78 = arith.addf %76, %77 : vector<16x128xf32>
    %c32 = arith.constant 32 : index
    %c0_29 = arith.constant 0 : index
    %79 = vector.load %arg11[%c32, %c0_29] : memref<128x384xf32, #tpu.memory_space<vmem>>, vector<16x384xf32>
    %80 = arith.truncf %78 : vector<16x128xf32> to vector<16x128xbf16>
    %cst_30 = arith.constant dense<0.000000e+00> : vector<16x384xf32>
    %81 = tpu.matmul %80, %26, %cst_30 {dimension_numbers = #tpu.dot_dimension_numbers<[1], [0], [0], [1], [0, 0, 1, 1], [], []>} : vector<16x128xbf16>, vector<128x384xbf16>, vector<16x384xf32> -> vector<16x384xf32>
    %82 = vector.extract_strided_slice %79 {offsets = [0, 0], sizes = [16, 256], strides = [1, 1]} : vector<16x384xf32> to vector<16x256xf32>
    %83 = vector.extract_strided_slice %81 {offsets = [0, 0], sizes = [16, 256], strides = [1, 1]} : vector<16x384xf32> to vector<16x256xf32>
    %84 = arith.addf %82, %83 : vector<16x256xf32>
    %85 = arith.negf %84 : vector<16x256xf32>
    %86 = math.exp %85 : vector<16x256xf32>
    %cst_31 = arith.constant 1.000000e+00 : f32
    %87 = vector.broadcast %cst_31 : f32 to vector<16x256xf32>
    %88 = arith.addf %87, %86 : vector<16x256xf32>
    %89 = arith.divf %87, %88 : vector<16x256xf32>
    %90 = vector.extract_strided_slice %89 {offsets = [0, 0], sizes = [16, 128], strides = [1, 1]} : vector<16x256xf32> to vector<16x128xf32>
    %91 = vector.extract_strided_slice %89 {offsets = [0, 128], sizes = [16, 128], strides = [1, 1]} : vector<16x256xf32> to vector<16x128xf32>
    %92 = vector.extract_strided_slice %79 {offsets = [0, 256], sizes = [16, 128], strides = [1, 1]} : vector<16x384xf32> to vector<16x128xf32>
    %93 = vector.extract_strided_slice %81 {offsets = [0, 256], sizes = [16, 128], strides = [1, 1]} : vector<16x384xf32> to vector<16x128xf32>
    %94 = arith.addf %93, %29 : vector<16x128xf32>
    %95 = arith.mulf %90, %94 : vector<16x128xf32>
    %96 = arith.addf %92, %95 : vector<16x128xf32>
    %97 = math.tanh %96 : vector<16x128xf32>
    %cst_32 = arith.constant 1.000000e+00 : f32
    %98 = vector.broadcast %cst_32 : f32 to vector<16x128xf32>
    %99 = arith.subf %98, %91 : vector<16x128xf32>
    %100 = arith.mulf %99, %97 : vector<16x128xf32>
    %101 = arith.mulf %91, %78 : vector<16x128xf32>
    %102 = arith.addf %100, %101 : vector<16x128xf32>
    %c48 = arith.constant 48 : index
    %c0_33 = arith.constant 0 : index
    %103 = vector.load %arg11[%c48, %c0_33] : memref<128x384xf32, #tpu.memory_space<vmem>>, vector<16x384xf32>
    %104 = arith.truncf %102 : vector<16x128xf32> to vector<16x128xbf16>
    %cst_34 = arith.constant dense<0.000000e+00> : vector<16x384xf32>
    %105 = tpu.matmul %104, %26, %cst_34 {dimension_numbers = #tpu.dot_dimension_numbers<[1], [0], [0], [1], [0, 0, 1, 1], [], []>} : vector<16x128xbf16>, vector<128x384xbf16>, vector<16x384xf32> -> vector<16x384xf32>
    %106 = vector.extract_strided_slice %103 {offsets = [0, 0], sizes = [16, 256], strides = [1, 1]} : vector<16x384xf32> to vector<16x256xf32>
    %107 = vector.extract_strided_slice %105 {offsets = [0, 0], sizes = [16, 256], strides = [1, 1]} : vector<16x384xf32> to vector<16x256xf32>
    %108 = arith.addf %106, %107 : vector<16x256xf32>
    %109 = arith.negf %108 : vector<16x256xf32>
    %110 = math.exp %109 : vector<16x256xf32>
    %cst_35 = arith.constant 1.000000e+00 : f32
    %111 = vector.broadcast %cst_35 : f32 to vector<16x256xf32>
    %112 = arith.addf %111, %110 : vector<16x256xf32>
    %113 = arith.divf %111, %112 : vector<16x256xf32>
    %114 = vector.extract_strided_slice %113 {offsets = [0, 0], sizes = [16, 128], strides = [1, 1]} : vector<16x256xf32> to vector<16x128xf32>
    %115 = vector.extract_strided_slice %113 {offsets = [0, 128], sizes = [16, 128], strides = [1, 1]} : vector<16x256xf32> to vector<16x128xf32>
    %116 = vector.extract_strided_slice %103 {offsets = [0, 256], sizes = [16, 128], strides = [1, 1]} : vector<16x384xf32> to vector<16x128xf32>
    %117 = vector.extract_strided_slice %105 {offsets = [0, 256], sizes = [16, 128], strides = [1, 1]} : vector<16x384xf32> to vector<16x128xf32>
    %118 = arith.addf %117, %29 : vector<16x128xf32>
    %119 = arith.mulf %114, %118 : vector<16x128xf32>
    %120 = arith.addf %116, %119 : vector<16x128xf32>
    %121 = math.tanh %120 : vector<16x128xf32>
    %cst_36 = arith.constant 1.000000e+00 : f32
    %122 = vector.broadcast %cst_36 : f32 to vector<16x128xf32>
    %123 = arith.subf %122, %115 : vector<16x128xf32>
    %124 = arith.mulf %123, %121 : vector<16x128xf32>
    %125 = arith.mulf %115, %102 : vector<16x128xf32>
    %126 = arith.addf %124, %125 : vector<16x128xf32>
    %c64 = arith.constant 64 : index
    %c0_37 = arith.constant 0 : index
    %127 = vector.load %arg11[%c64, %c0_37] : memref<128x384xf32, #tpu.memory_space<vmem>>, vector<16x384xf32>
    %128 = arith.truncf %126 : vector<16x128xf32> to vector<16x128xbf16>
    %cst_38 = arith.constant dense<0.000000e+00> : vector<16x384xf32>
    %129 = tpu.matmul %128, %26, %cst_38 {dimension_numbers = #tpu.dot_dimension_numbers<[1], [0], [0], [1], [0, 0, 1, 1], [], []>} : vector<16x128xbf16>, vector<128x384xbf16>, vector<16x384xf32> -> vector<16x384xf32>
    %130 = vector.extract_strided_slice %127 {offsets = [0, 0], sizes = [16, 256], strides = [1, 1]} : vector<16x384xf32> to vector<16x256xf32>
    %131 = vector.extract_strided_slice %129 {offsets = [0, 0], sizes = [16, 256], strides = [1, 1]} : vector<16x384xf32> to vector<16x256xf32>
    %132 = arith.addf %130, %131 : vector<16x256xf32>
    %133 = arith.negf %132 : vector<16x256xf32>
    %134 = math.exp %133 : vector<16x256xf32>
    %cst_39 = arith.constant 1.000000e+00 : f32
    %135 = vector.broadcast %cst_39 : f32 to vector<16x256xf32>
    %136 = arith.addf %135, %134 : vector<16x256xf32>
    %137 = arith.divf %135, %136 : vector<16x256xf32>
    %138 = vector.extract_strided_slice %137 {offsets = [0, 0], sizes = [16, 128], strides = [1, 1]} : vector<16x256xf32> to vector<16x128xf32>
    %139 = vector.extract_strided_slice %137 {offsets = [0, 128], sizes = [16, 128], strides = [1, 1]} : vector<16x256xf32> to vector<16x128xf32>
    %140 = vector.extract_strided_slice %127 {offsets = [0, 256], sizes = [16, 128], strides = [1, 1]} : vector<16x384xf32> to vector<16x128xf32>
    %141 = vector.extract_strided_slice %129 {offsets = [0, 256], sizes = [16, 128], strides = [1, 1]} : vector<16x384xf32> to vector<16x128xf32>
    %142 = arith.addf %141, %29 : vector<16x128xf32>
    %143 = arith.mulf %138, %142 : vector<16x128xf32>
    %144 = arith.addf %140, %143 : vector<16x128xf32>
    %145 = math.tanh %144 : vector<16x128xf32>
    %cst_40 = arith.constant 1.000000e+00 : f32
    %146 = vector.broadcast %cst_40 : f32 to vector<16x128xf32>
    %147 = arith.subf %146, %139 : vector<16x128xf32>
    %148 = arith.mulf %147, %145 : vector<16x128xf32>
    %149 = arith.mulf %139, %126 : vector<16x128xf32>
    %150 = arith.addf %148, %149 : vector<16x128xf32>
    %c80 = arith.constant 80 : index
    %c0_41 = arith.constant 0 : index
    %151 = vector.load %arg11[%c80, %c0_41] : memref<128x384xf32, #tpu.memory_space<vmem>>, vector<16x384xf32>
    %152 = arith.truncf %150 : vector<16x128xf32> to vector<16x128xbf16>
    %cst_42 = arith.constant dense<0.000000e+00> : vector<16x384xf32>
    %153 = tpu.matmul %152, %26, %cst_42 {dimension_numbers = #tpu.dot_dimension_numbers<[1], [0], [0], [1], [0, 0, 1, 1], [], []>} : vector<16x128xbf16>, vector<128x384xbf16>, vector<16x384xf32> -> vector<16x384xf32>
    %154 = vector.extract_strided_slice %151 {offsets = [0, 0], sizes = [16, 256], strides = [1, 1]} : vector<16x384xf32> to vector<16x256xf32>
    %155 = vector.extract_strided_slice %153 {offsets = [0, 0], sizes = [16, 256], strides = [1, 1]} : vector<16x384xf32> to vector<16x256xf32>
    %156 = arith.addf %154, %155 : vector<16x256xf32>
    %157 = arith.negf %156 : vector<16x256xf32>
    %158 = math.exp %157 : vector<16x256xf32>
    %cst_43 = arith.constant 1.000000e+00 : f32
    %159 = vector.broadcast %cst_43 : f32 to vector<16x256xf32>
    %160 = arith.addf %159, %158 : vector<16x256xf32>
    %161 = arith.divf %159, %160 : vector<16x256xf32>
    %162 = vector.extract_strided_slice %161 {offsets = [0, 0], sizes = [16, 128], strides = [1, 1]} : vector<16x256xf32> to vector<16x128xf32>
    %163 = vector.extract_strided_slice %161 {offsets = [0, 128], sizes = [16, 128], strides = [1, 1]} : vector<16x256xf32> to vector<16x128xf32>
    %164 = vector.extract_strided_slice %151 {offsets = [0, 256], sizes = [16, 128], strides = [1, 1]} : vector<16x384xf32> to vector<16x128xf32>
    %165 = vector.extract_strided_slice %153 {offsets = [0, 256], sizes = [16, 128], strides = [1, 1]} : vector<16x384xf32> to vector<16x128xf32>
    %166 = arith.addf %165, %29 : vector<16x128xf32>
    %167 = arith.mulf %162, %166 : vector<16x128xf32>
    %168 = arith.addf %164, %167 : vector<16x128xf32>
    %169 = math.tanh %168 : vector<16x128xf32>
    %cst_44 = arith.constant 1.000000e+00 : f32
    %170 = vector.broadcast %cst_44 : f32 to vector<16x128xf32>
    %171 = arith.subf %170, %163 : vector<16x128xf32>
    %172 = arith.mulf %171, %169 : vector<16x128xf32>
    %173 = arith.mulf %163, %150 : vector<16x128xf32>
    %174 = arith.addf %172, %173 : vector<16x128xf32>
    %c96 = arith.constant 96 : index
    %c0_45 = arith.constant 0 : index
    %175 = vector.load %arg11[%c96, %c0_45] : memref<128x384xf32, #tpu.memory_space<vmem>>, vector<16x384xf32>
    %176 = arith.truncf %174 : vector<16x128xf32> to vector<16x128xbf16>
    %cst_46 = arith.constant dense<0.000000e+00> : vector<16x384xf32>
    %177 = tpu.matmul %176, %26, %cst_46 {dimension_numbers = #tpu.dot_dimension_numbers<[1], [0], [0], [1], [0, 0, 1, 1], [], []>} : vector<16x128xbf16>, vector<128x384xbf16>, vector<16x384xf32> -> vector<16x384xf32>
    %178 = vector.extract_strided_slice %175 {offsets = [0, 0], sizes = [16, 256], strides = [1, 1]} : vector<16x384xf32> to vector<16x256xf32>
    %179 = vector.extract_strided_slice %177 {offsets = [0, 0], sizes = [16, 256], strides = [1, 1]} : vector<16x384xf32> to vector<16x256xf32>
    %180 = arith.addf %178, %179 : vector<16x256xf32>
    %181 = arith.negf %180 : vector<16x256xf32>
    %182 = math.exp %181 : vector<16x256xf32>
    %cst_47 = arith.constant 1.000000e+00 : f32
    %183 = vector.broadcast %cst_47 : f32 to vector<16x256xf32>
    %184 = arith.addf %183, %182 : vector<16x256xf32>
    %185 = arith.divf %183, %184 : vector<16x256xf32>
    %186 = vector.extract_strided_slice %185 {offsets = [0, 0], sizes = [16, 128], strides = [1, 1]} : vector<16x256xf32> to vector<16x128xf32>
    %187 = vector.extract_strided_slice %185 {offsets = [0, 128], sizes = [16, 128], strides = [1, 1]} : vector<16x256xf32> to vector<16x128xf32>
    %188 = vector.extract_strided_slice %175 {offsets = [0, 256], sizes = [16, 128], strides = [1, 1]} : vector<16x384xf32> to vector<16x128xf32>
    %189 = vector.extract_strided_slice %177 {offsets = [0, 256], sizes = [16, 128], strides = [1, 1]} : vector<16x384xf32> to vector<16x128xf32>
    %190 = arith.addf %189, %29 : vector<16x128xf32>
    %191 = arith.mulf %186, %190 : vector<16x128xf32>
    %192 = arith.addf %188, %191 : vector<16x128xf32>
    %193 = math.tanh %192 : vector<16x128xf32>
    %cst_48 = arith.constant 1.000000e+00 : f32
    %194 = vector.broadcast %cst_48 : f32 to vector<16x128xf32>
    %195 = arith.subf %194, %187 : vector<16x128xf32>
    %196 = arith.mulf %195, %193 : vector<16x128xf32>
    %197 = arith.mulf %187, %174 : vector<16x128xf32>
    %198 = arith.addf %196, %197 : vector<16x128xf32>
    %c112 = arith.constant 112 : index
    %c0_49 = arith.constant 0 : index
    %199 = vector.load %arg11[%c112, %c0_49] : memref<128x384xf32, #tpu.memory_space<vmem>>, vector<16x384xf32>
    %200 = arith.truncf %198 : vector<16x128xf32> to vector<16x128xbf16>
    %cst_50 = arith.constant dense<0.000000e+00> : vector<16x384xf32>
    %201 = tpu.matmul %200, %26, %cst_50 {dimension_numbers = #tpu.dot_dimension_numbers<[1], [0], [0], [1], [0, 0, 1, 1], [], []>} : vector<16x128xbf16>, vector<128x384xbf16>, vector<16x384xf32> -> vector<16x384xf32>
    %202 = vector.extract_strided_slice %199 {offsets = [0, 0], sizes = [16, 256], strides = [1, 1]} : vector<16x384xf32> to vector<16x256xf32>
    %203 = vector.extract_strided_slice %201 {offsets = [0, 0], sizes = [16, 256], strides = [1, 1]} : vector<16x384xf32> to vector<16x256xf32>
    %204 = arith.addf %202, %203 : vector<16x256xf32>
    %205 = arith.negf %204 : vector<16x256xf32>
    %206 = math.exp %205 : vector<16x256xf32>
    %cst_51 = arith.constant 1.000000e+00 : f32
    %207 = vector.broadcast %cst_51 : f32 to vector<16x256xf32>
    %208 = arith.addf %207, %206 : vector<16x256xf32>
    %209 = arith.divf %207, %208 : vector<16x256xf32>
    %210 = vector.extract_strided_slice %209 {offsets = [0, 0], sizes = [16, 128], strides = [1, 1]} : vector<16x256xf32> to vector<16x128xf32>
    %211 = vector.extract_strided_slice %209 {offsets = [0, 128], sizes = [16, 128], strides = [1, 1]} : vector<16x256xf32> to vector<16x128xf32>
    %212 = vector.extract_strided_slice %199 {offsets = [0, 256], sizes = [16, 128], strides = [1, 1]} : vector<16x384xf32> to vector<16x128xf32>
    %213 = vector.extract_strided_slice %201 {offsets = [0, 256], sizes = [16, 128], strides = [1, 1]} : vector<16x384xf32> to vector<16x128xf32>
    %214 = arith.addf %213, %29 : vector<16x128xf32>
    %215 = arith.mulf %210, %214 : vector<16x128xf32>
    %216 = arith.addf %212, %215 : vector<16x128xf32>
    %217 = math.tanh %216 : vector<16x128xf32>
    %cst_52 = arith.constant 1.000000e+00 : f32
    %218 = vector.broadcast %cst_52 : f32 to vector<16x128xf32>
    %219 = arith.subf %218, %211 : vector<16x128xf32>
    %220 = arith.mulf %219, %217 : vector<16x128xf32>
    %221 = arith.mulf %211, %198 : vector<16x128xf32>
    %222 = arith.addf %220, %221 : vector<16x128xf32>
    %c0_53 = arith.constant 0 : index
    %c0_54 = arith.constant 0 : index
    %223 = vector.load %arg8[%c0_53, %c0_54] : memref<128x128xf32, #tpu.memory_space<vmem>>, vector<128x128xf32>
    %cst_55 = arith.constant dense<0.000000e+00> : vector<16x128xf32>
    %224 = tpu.matmul %222, %223, %cst_55 {dimension_numbers = #tpu.dot_dimension_numbers<[1], [0], [0], [1], [0, 0, 1, 1], [], []>} : vector<16x128xf32>, vector<128x128xf32>, vector<16x128xf32> -> vector<16x128xf32>
    %c0_56 = arith.constant 0 : index
    %c0_57 = arith.constant 0 : index
    %225 = vector.load %arg9[%c0_56, %c0_57] : memref<1x128xf32, #tpu.memory_space<vmem>>, vector<1x128xf32>
    %226 = vector.broadcast %225 : vector<1x128xf32> to vector<16x128xf32>
    %227 = arith.addf %224, %226 : vector<16x128xf32>
    %c0_58 = arith.constant 0 : index
    %c0_59 = arith.constant 0 : index
    %c0_60 = arith.constant 0 : index
    %228 = vector.load %arg10[%c0_58, %c0_59, %c0_60] : memref<1x16x128xf32, #tpu.memory_space<vmem>>, vector<1x16x128xf32>
    %229 = vector.shape_cast %228 : vector<1x16x128xf32> to vector<16x128xf32>
    %230 = vector.shape_cast %227 : vector<16x128xf32> to vector<1x16x128xf32>
    tpu.vector_store %arg10[%c0_58, %c0_59, %c0_60], %230 {strides = array<i32>} : memref<1x16x128xf32, #tpu.memory_space<vmem>>, vector<1x16x128xf32>,
    return
  }
  func.func @transform_0(%arg0: i32) -> (i32, i32, i32) {
    %c0_i32 = arith.constant 0 : i32
    %c0_i32_0 = arith.constant 0 : i32
    %c0_i32_1 = arith.constant 0 : i32
    return %arg0, %c0_i32, %c0_i32_0 : i32, i32, i32
  }
  func.func @transform_1(%arg0: i32) -> (i32, i32) {
    %c0_i32 = arith.constant 0 : i32
    %c0_i32_0 = arith.constant 0 : i32
    %c0_i32_1 = arith.constant 0 : i32
    return %c0_i32, %c0_i32_0 : i32, i32
  }
  func.func @transform_2(%arg0: i32) -> (i32, i32) {
    %c0_i32 = arith.constant 0 : i32
    %c0_i32_0 = arith.constant 0 : i32
    %c0_i32_1 = arith.constant 0 : i32
    return %c0_i32, %c0_i32_0 : i32, i32
  }
  func.func @transform_3(%arg0: i32) -> (i32, i32) {
    %c0_i32 = arith.constant 0 : i32
    %c0_i32_0 = arith.constant 0 : i32
    %c0_i32_1 = arith.constant 0 : i32
    return %c0_i32, %c0_i32_0 : i32, i32
  }
  func.func @transform_4(%arg0: i32) -> (i32, i32) {
    %c0_i32 = arith.constant 0 : i32
    %c0_i32_0 = arith.constant 0 : i32
    %c0_i32_1 = arith.constant 0 : i32
    return %c0_i32, %c0_i32_0 : i32, i32
  }
  func.func @transform_5(%arg0: i32) -> (i32, i32) {
    %c0_i32 = arith.constant 0 : i32
    %c0_i32_0 = arith.constant 0 : i32
    %c0_i32_1 = arith.constant 0 : i32
    return %c0_i32, %c0_i32_0 : i32, i32
  }
  func.func @transform_6(%arg0: i32) -> (i32, i32) {
    %c0_i32 = arith.constant 0 : i32
    %c0_i32_0 = arith.constant 0 : i32
    %c0_i32_1 = arith.constant 0 : i32
    return %c0_i32, %c0_i32_0 : i32, i32
  }
  func.func @transform_7(%arg0: i32) -> (i32, i32) {
    %c0_i32 = arith.constant 0 : i32
    %c0_i32_0 = arith.constant 0 : i32
    %c0_i32_1 = arith.constant 0 : i32
    return %c0_i32, %c0_i32_0 : i32, i32
  }
  func.func @transform_8(%arg0: i32) -> (i32, i32) {
    %c0_i32 = arith.constant 0 : i32
    %c0_i32_0 = arith.constant 0 : i32
    %c0_i32_1 = arith.constant 0 : i32
    return %c0_i32, %c0_i32_0 : i32, i32
  }
  func.func @transform_9(%arg0: i32) -> (i32, i32, i32) {
    %c0_i32 = arith.constant 0 : i32
    %c0_i32_0 = arith.constant 0 : i32
    %c0_i32_1 = arith.constant 0 : i32
    return %arg0, %c0_i32, %c0_i32_0 : i32, i32, i32
  }
}

</mosaic_0001>

<bundles_post_ra>
// kernel: transnetwork21_forward.1
= control target key start
LH: loop header
LB: loop body
LE: loop exit
PB: predicated region body
PF: predicated region fallthrough
CT: control target
= control target key end

     0   :  { %v4251_v1 = vmov 0   ;;  %v4253_v58 = vmov 0.0   ;;  %vm3117_vm0 = vmmov 0   ;;  %s4241_s1 = inlined_call_operand.vmem [shape: bf16[128,384], index: 1, kind: input, shape index: {}]   ;;  %s4242_s0 = inlined_call_operand.vmem [shape: bf16[1,128,128], index: 0, kind: input, shape index: {}]   ;;  %s4243_s3 = inlined_call_operand.vmem [shape: bf16[128,384], index: 3, kind: input, shape index: {}]   ;;  %s4244_s5 = inlined_call_operand.vmem [shape: bf16[128,384], index: 5, kind: input, shape index: {}]   ;;  %s4245_s2 = inlined_call_operand.vmem [shape: f32[1,128], index: 2, kind: input, shape index: {}]   ;;  %s4246_s4 = inlined_call_operand.vmem [shape: f32[1,384], index: 4, kind: input, shape index: {}]   ;;  %s4247_s6 = inlined_call_operand.vmem [shape: f32[1,128], index: 6, kind: input, shape index: {}]   ;;  %s4248_s7 = inlined_call_operand.vmem [shape: f32[128,128], index: 7, kind: input, shape index: {}]   ;;  %s4249_s8 = inlined_call_operand.vmem [shape: f32[1,128], index: 8, kind: input, shape index: {}]   ;;  %s4250_s9 = inlined_call_operand.vmem [shape: f32[1,16,128], index: 9, kind: output, shape index: {}]  }
   0x1   :  { %v2826_v0 = vld [vmem:[%s4241_s1 + $0xac] ss:$12 sps:$4 sm:$0xff]   ;;  %289 = vmatprep.mubr.bf16.mxu0 %v4251_v1  ;;  %v2828_v2 = vld [vmem:[%s4241_s1 + $0xa8] ss:$12 sps:$4 sm:$0xff]   ;;  %v2829_v3 = vld [vmem:[%s4241_s1 + $0xb0] ss:$12 sps:$4 sm:$0xff]  }
   0x2   :  { %257 = vmatprep.subr.bf16.mxu0 %v2826_v0  ;;  %v2830_v4 = vld [vmem:[%s4241_s1 + $0x94] ss:$12 sps:$4 sm:$0xff]   ;;  %v2832_v5 = vld [vmem:[%s4241_s1 + $0x90] ss:$12 sps:$4 sm:$0xff]   ;;  %2564 = vmatprep.subr.bf16.mxu1 %v2829_v3  ;;  %v2833_v6 = vld [vmem:[%s4241_s1 + $0x98] ss:$12 sps:$4 sm:$0xff]  }
   0x3   :  { %258 = vmatpush1.bf16.msra.mxu0 %v2828_v2  ;;  %2565 = vmatpush3.bf16.msra.mxu1 %v2829_v3  ;;  %v2834_v7 = vld [vmem:[%s4241_s1 + $0x7c] ss:$12 sps:$4 sm:$0xff]   ;;  %v2837_v8 = vld [vmem:[%s4241_s1 + $0x80] ss:$12 sps:$4 sm:$0xff]   ;;  %v2836_v9 = vld [vmem:[%s4241_s1 + $0x78] ss:$12 sps:$4 sm:$0xff]  }
   0x4   :  { %259 = vmatprep.subr.bf16.mxu0 %v2830_v4  ;;  %2566 = vmatprep.subr.bf16.mxu1 %v2833_v6  ;;  %v2838_v10 = vld [vmem:[%s4241_s1 + $0x64] ss:$12 sps:$4 sm:$0xff]   ;;  %v2841_v11 = vld [vmem:[%s4241_s1 + $0x68] ss:$12 sps:$4 sm:$0xff]   ;;  %v2840_v12 = vld [vmem:[%s4241_s1 + $0x60] ss:$12 sps:$4 sm:$0xff]  }
   0x5   :  { %v2842_v13 = vld [vmem:[%s4241_s1 + $0x4c] ss:$12 sps:$4 sm:$0xff]   ;;  %v2845_v14 = vld [vmem:[%s4241_s1 + $0x50] ss:$12 sps:$4 sm:$0xff]   ;;  %v2844_v15 = vld [vmem:[%s4241_s1 + $0x48] ss:$12 sps:$4 sm:$0xff]  }
   0x6   :  { %v2846_v16 = vld [vmem:[%s4241_s1 + $0x34] ss:$12 sps:$4 sm:$0xff]   ;;  %v2848_v17 = vld [vmem:[%s4241_s1 + $0x30] ss:$12 sps:$4 sm:$0xff]   ;;  %v2849_v18 = vld [vmem:[%s4241_s1 + $0x38] ss:$12 sps:$4 sm:$0xff]  }
   0x7   :  { %260 = vmatpush1.bf16.msra.mxu0 %v2832_v5  ;;  %2567 = vmatpush3.bf16.msra.mxu1 %v2833_v6  ;;  %v2858_v19 = vld [vmem:[%s4242_s0] sm:$0xff]   ;;  %v2850_v20 = vld [vmem:[%s4241_s1 + $0x1c] ss:$12 sps:$4 sm:$0xff]   ;;  %v2869_v27 = vld [vmem:[%s4243_s3 + $0xac] ss:$12 sps:$4 sm:$0xff]  }
   0x8   :  { %261 = vmatprep.subr.bf16.mxu0 %v2834_v7  ;;  %2568 = vmatprep.subr.bf16.mxu1 %v2837_v8  ;;  %v2853_v21 = vld [vmem:[%s4241_s1 + $0x20] ss:$12 sps:$4 sm:$0xff]   ;;  %v2852_v22 = vld [vmem:[%s4241_s1 + $0x18] ss:$12 sps:$4 sm:$0xff]   ;;  %v2857_v24 = vld [vmem:[%s4241_s1 + $0x8] ss:$12 sps:$4 sm:$0xff]  }
   0x9   :  { %2580 = vmatprep.mubr.bf16.mxu1 %v2858_v19  ;;  %v2854_v23 = vld [vmem:[%s4241_s1 + $0x4] ss:$12 sps:$4 sm:$0xff]   ;;  %v2856_v25 = vld [vmem:[%s4241_s1] ss:$12 sps:$4 sm:$0xff]   ;;  %v2867_v31 = vld [vmem:[%s4243_s3 + $0xa8] ss:$12 sps:$4 sm:$0xff]  }
   0xa   :  { %v2866_v26 = vld [vmem:[%s4243_s3 + $0xb0] ss:$12 sps:$4 sm:$0xff]   ;;  %v2859_v28 = vld [vmem:[%s4242_s0 + $0x8] sm:$0xff]   ;;  %v2873_v29 = vld [vmem:[%s4243_s3 + $0x98] ss:$12 sps:$4 sm:$0xff]  }
   0xb   :  { %262 = vmatpush1.bf16.msra.mxu0 %v2836_v9  ;;  %2569 = vmatpush3.bf16.msra.mxu1 %v2837_v8  ;;  %v2860_v30 = vld [vmem:[%s4242_s0 + $0x10] sm:$0xff]   ;;  %v2876_v34 = vld [vmem:[%s4243_s3 + $0x7c] ss:$12 sps:$4 sm:$0xff]   ;;  %v2880_v35 = vld [vmem:[%s4243_s3 + $0x80] ss:$12 sps:$4 sm:$0xff]  }
   0xc   :  { %263 = vmatprep.subr.bf16.mxu0 %v2838_v10  ;;  %2570 = vmatprep.subr.bf16.mxu1 %v2841_v11  ;;  %v2872_v32 = vld [vmem:[%s4243_s3 + $0x94] ss:$12 sps:$4 sm:$0xff]   ;;  %v2870_v33 = vld [vmem:[%s4243_s3 + $0x90] ss:$12 sps:$4 sm:$0xff]   ;;  %v2874_v38 = vld [vmem:[%s4243_s3 + $0x78] ss:$12 sps:$4 sm:$0xff]  }
   0xd   :  { %v2861_v36 = vld [vmem:[%s4242_s0 + $0x18] sm:$0xff]   ;;  %v2862_v37 = vld [vmem:[%s4242_s0 + $0x20] sm:$0xff]   ;;  %v2863_v42 = vld [vmem:[%s4242_s0 + $0x28] sm:$0xff]  }
   0xe   :  { %v2879_v39 = vld [vmem:[%s4243_s3 + $0x64] ss:$12 sps:$4 sm:$0xff]   ;;  %v2877_v40 = vld [vmem:[%s4243_s3 + $0x60] ss:$12 sps:$4 sm:$0xff]   ;;  %v2881_v44 = vld [vmem:[%s4243_s3 + $0x48] ss:$12 sps:$4 sm:$0xff]  }
   0xf   :  { %264 = vmatpush1.bf16.msra.mxu0 %v2840_v12  ;;  %2571 = vmatpush3.bf16.msra.mxu1 %v2841_v11  ;;  %v2883_v41 = vld [vmem:[%s4243_s3 + $0x4c] ss:$12 sps:$4 sm:$0xff]   ;;  %v2864_v43 = vld [vmem:[%s4242_s0 + $0x30] sm:$0xff]   ;;  %v2890_v49 = vld [vmem:[%s4243_s3 + $0x1c] ss:$12 sps:$4 sm:$0xff]  }
  0x10   :  { %265 = vmatprep.subr.bf16.mxu0 %v2842_v13  ;;  %2572 = vmatprep.subr.bf16.mxu1 %v2845_v14  ;;  %v2865_v45 = vld [vmem:[%s4242_s0 + $0x38] sm:$0xff]   ;;  %v2886_v46 = vld [vmem:[%s4243_s3 + $0x34] ss:$12 sps:$4 sm:$0xff]   ;;  %v2894_v52 = vld [vmem:[%s4243_s3 + $0x4] ss:$12 sps:$4 sm:$0xff]  }
  0x11   :  { %v2884_v47 = vld [vmem:[%s4243_s3 + $0x30] ss:$12 sps:$4 sm:$0xff]   ;;  %v2887_v48 = vld [vmem:[%s4243_s3 + $0x68] ss:$12 sps:$4 sm:$0xff]   ;;  %v2888_v50 = vld [vmem:[%s4243_s3 + $0x18] ss:$12 sps:$4 sm:$0xff]  }
  0x12   :  { %v2891_v51 = vld [vmem:[%s4243_s3 + $0x50] ss:$12 sps:$4 sm:$0xff]   ;;  %v2892_v53 = vld [vmem:[%s4243_s3] ss:$12 sps:$4 sm:$0xff]   ;;  %v2895_v54 = vld [vmem:[%s4243_s3 + $0x38] ss:$12 sps:$4 sm:$0xff]  }
  0x13   :  { %266 = vmatpush1.bf16.msra.mxu0 %v2844_v15  ;;  %2573 = vmatpush3.bf16.msra.mxu1 %v2845_v14  ;;  %v2896_v55 = vld [vmem:[%s4243_s3 + $0x20] ss:$12 sps:$4 sm:$0xff]   ;;  %v2897_v56 = vld [vmem:[%s4243_s3 + $0x8] ss:$12 sps:$4 sm:$0xff]  }
  0x14   :  { %267 = vmatprep.subr.bf16.mxu0 %v2846_v16  ;;  %2574 = vmatprep.subr.bf16.mxu1 %v2849_v18  ;;  %v3348_v57 = vld [vmem:[%s4244_s5 + $0xac] ss:$12 sps:$4 sm:$0xff]   ;;  %v3355_v63 = vld [vmem:[%s4245_s2] ss:$0 sm:$0xff] }
  0x17   :  { %268 = vmatpush1.bf16.msra.mxu0 %v2848_v17  ;;  %2575 = vmatpush3.bf16.msra.mxu1 %v2849_v18  ;;  %v3362_v17 = vld [vmem:[%s4244_s5 + $0xb0] ss:$12 sps:$4 sm:$0xff]  }
  0x18   :  { %269 = vmatprep.subr.bf16.mxu0 %v2850_v20  ;;  %2576 = vmatprep.subr.bf16.mxu1 %v2853_v21 }
  0x1b   :  { %270 = vmatpush1.bf16.msra.mxu0 %v2852_v22  ;;  %2577 = vmatpush3.bf16.msra.mxu1 %v2853_v21 }
  0x1c   :  { %271 = vmatprep.subr.bf16.mxu0 %v2854_v23  ;;  %2578 = vmatprep.subr.bf16.mxu1 %v2857_v24 }
  0x1f   :  { %272 = vmatpush1.bf16.msra.mxu0 %v2856_v25  ;;  %2579 = vmatpush3.bf16.msra.mxu1 %v2857_v24  ;;  %v3369_v25 = vld [vmem:[%s4244_s5 + $0x98] ss:$12 sps:$4 sm:$0xff]  }
  0x20   :  { %2596 = vmatprep.subr.bf16.mxu0 %v2866_v26  ;;  %719 = vmatprep.subr.bf16.mxu1 %v2869_v27 }
  0x22   :  { %290 = vmatmul.mubr.bf16.vlgmr.msra.gmra.mxu0 %v2858_v19  ;;  %2581 = vmatmul.mubr.bf16.vlgmr.msra.gmra.mxu1 %v2859_v28 }
  0x23   :  { %299 = vmatprep.mubr.bf16.mxu0 %v4251_v1  ;;  %2597 = vmatpush3.bf16.msra.mxu0 %v2866_v26 }
  0x24   :  { %2598 = vmatprep.subr.bf16.mxu0 %v2873_v29  ;;  %2584 = vmatprep.mubr.bf16.mxu1 %v2860_v30 }
  0x25   :  { %720 = vmatpush1.bf16.msra.mxu1 %v2867_v31 }
  0x26   :  { %721 = vmatprep.subr.bf16.mxu1 %v2872_v32 }
  0x27   :  { %2599 = vmatpush3.bf16.msra.mxu0 %v2873_v29 }
  0x28   :  { %2600 = vmatprep.subr.bf16.mxu0 %v2880_v35 }
  0x29   :  { %722 = vmatpush1.bf16.msra.mxu1 %v2870_v33  ;;  %v3380_v33 = vld [vmem:[%s4244_s5 + $0x80] ss:$12 sps:$4 sm:$0xff]  }
  0x2a   :  { %300 = vmatmul.mubr.bf16.gmra.mxu0 %v2859_v28  ;;  %723 = vmatprep.subr.bf16.mxu1 %v2876_v34 }
  0x2b   :  { %309 = vmatprep.mubr.bf16.mxu0 %v4251_v1  ;;  %2601 = vmatpush3.bf16.msra.mxu0 %v2880_v35 }
  0x2c   :  { %2585 = vmatmul.mubr.bf16.gmra.mxu1 %v2861_v36  ;;  %2602 = vmatprep.subr.bf16.mxu0 %v2887_v48 }
  0x2d   :  { %2588 = vmatprep.mubr.bf16.mxu1 %v2862_v37  ;;  %724 = vmatpush1.bf16.msra.mxu1 %v2874_v38 }
  0x2e   :  { %725 = vmatprep.subr.bf16.mxu1 %v2879_v39  ;;  %v3386_v39 = vld [vmem:[%s4244_s5 + $0xa8] ss:$12 sps:$4 sm:$0xff]  }
  0x2f   :  { %2603 = vmatpush3.bf16.msra.mxu0 %v2887_v48 }
  0x30   :  { %2604 = vmatprep.subr.bf16.mxu0 %v2891_v51 }
  0x31   :  { %726 = vmatpush1.bf16.msra.mxu1 %v2877_v40 }
  0x32   :  { %310 = vmatmul.mubr.bf16.gmra.mxu0 %v2860_v30  ;;  %727 = vmatprep.subr.bf16.mxu1 %v2883_v41 }
  0x33   :  { %319 = vmatprep.mubr.bf16.mxu0 %v4251_v1  ;;  %2605 = vmatpush3.bf16.msra.mxu0 %v2891_v51 }
  0x34   :  { %2589 = vmatmul.mubr.bf16.gmra.mxu1 %v2863_v42  ;;  %2606 = vmatprep.subr.bf16.mxu0 %v2895_v54 }
  0x35   :  { %2592 = vmatprep.mubr.bf16.mxu1 %v2864_v43  ;;  %728 = vmatpush1.bf16.msra.mxu1 %v2881_v44  ;;  %v3397_v44 = vld [vmem:[%s4244_s5 + $0x68] ss:$12 sps:$4 sm:$0xff]  }
  0x36   :  { %729 = vmatprep.subr.bf16.mxu1 %v2886_v46 }
  0x37   :  { %2607 = vmatpush3.bf16.msra.mxu0 %v2895_v54  ;;  %v3419_v54 = vld [vmem:[%s4244_s5 + $0x50] ss:$12 sps:$4 sm:$0xff]  }
  0x38   :  { %2608 = vmatprep.subr.bf16.mxu0 %v2896_v55 }
  0x39   :  { %730 = vmatpush1.bf16.msra.mxu1 %v2884_v47 }
  0x3a   :  { %320 = vmatmul.mubr.bf16.gmra.mxu0 %v2861_v36  ;;  %731 = vmatprep.subr.bf16.mxu1 %v2890_v49  ;;  %v3405_v49 = vld [vmem:[%s4244_s5 + $0x90] ss:$12 sps:$4 sm:$0xff]  }
  0x3b   :  { %329 = vmatprep.mubr.bf16.mxu0 %v4251_v1  ;;  %2609 = vmatpush3.bf16.msra.mxu0 %v2896_v55 }
  0x3c   :  { %2593 = vmatmul.mubr.bf16.gmra.mxu1 %v2865_v45  ;;  %2610 = vmatprep.subr.bf16.mxu0 %v2897_v56 }
  0x3d   :  { %751 = vmatprep.mubr.bf16.mxu1 %v4251_v1  ;;  %732 = vmatpush1.bf16.msra.mxu1 %v2888_v50 }
  0x3e   :  { %733 = vmatprep.subr.bf16.mxu1 %v2894_v52  ;;  %v3412_v52 = vld [vmem:[%s4244_s5 + $0x7c] ss:$12 sps:$4 sm:$0xff]  }
  0x3f   :  { %2611 = vmatpush3.bf16.msra.mxu0 %v2897_v56 }
  0x40   :  { %1150 = vmatprep.subr.bf16.mxu0 %v3348_v57 }
  0x41   :  { %734 = vmatpush1.bf16.msra.mxu1 %v2892_v53 }
  0x42   :  { %330 = vmatmul.mubr.bf16.gmra.mxu0 %v2862_v37  ;;  %2628 = vmatprep.subr.bf16.mxu1 %v4253_v58 }
  0x43   :  { %339 = vmatprep.mubr.bf16.mxu0 %v4251_v1 }
  0x4a   :  { %340 = vmatmul.mubr.bf16.gmra.mxu0 %v2863_v42  ;;  %v3391_v42 = vld [vmem:[%s4244_s5 + $0x94] ss:$12 sps:$4 sm:$0xff]  }
  0x4b   :  { %349 = vmatprep.mubr.bf16.mxu0 %v4251_v1 }
  0x52   :  { %350 = vmatmul.mubr.bf16.gmra.mxu0 %v2864_v43 }
  0x53   :  { %359 = vmatprep.mubr.bf16.mxu0 %v4251_v1 }
  0x5a   :  { %360 = vmatmul.mubr.bf16.gmra.mxu0 %v2865_v45 }
  0xe2   :  { %v291_v59 = vpop.f32.mrf.mxu0  ;;  %v2582_v61 = vpop.f32.mrf.mxu1 }
  0xe4   :  { %v293_v60 = vpop.f32.mrf.mxu0  ;;  %v402_v2 = vpop.f32.mrf.mxu1 }
  0xe5   :  { %v479_v62 = vadd.f32 %v2582_v61, %v293_v60 }
  0xe6   :  { %v295_v0 = vpop.f32.mrf.mxu0  ;;  %v2583_v4 = vpop.f32.mrf.mxu1 }
  0xe7   :  { %v502_v5 = vadd.f32 %v3355_v63, %v479_v62  ;;  %v3426_v62 = vld [vmem:[%s4244_s5 + $0x78] ss:$12 sps:$4 sm:$0xff]  }
  0xe8   :  { %v297_v3 = vpop.f32.mrf.mxu0  ;;  %v404_v8 = vpop.f32.mrf.mxu1 }
  0xe9   :  { %v480_v6 = vadd.f32 %v2583_v4, %v297_v3  ;;  %v518_v12 = vmax.f32 %v502_v5, 0.0  ;;  %v3432_v3 = vld [vmem:[%s4244_s5 + $0x64] ss:$12 sps:$4 sm:$0xff]  }
  0xea   :  { %v301_v7 = vpop.f32.mrf.mxu0  ;;  %v3438_v5 = vld [vmem:[%s4244_s5 + $0x38] ss:$12 sps:$4 sm:$0xff]  }
  0xeb   :  { %v503_v9 = vadd.f32 %v3355_v63, %v480_v6 }
  0xec   :  { %v303_v10 = vpop.f32.mrf.mxu0  ;;  %v2586_v11 = vpop.f32.mrf.mxu1 }
  0xed   :  { %v519_v13 = vmax.f32 %v503_v9, 0.0  ;;  %v465_v14 = vadd.f32 %v303_v10, %v291_v59  ;;  %v3448_v10 = vld [vmem:[%s4244_s5 + $0x60] ss:$12 sps:$4 sm:$0xff]  }
  0xee   :  { %v305_v15 = vpop.f32.mrf.mxu0  ;;  %v416_v16 = vpop.f32.mrf.mxu1 }
  0xef   :  { %v534_v18 = vpack.c.bf16 %v519_v13, %v518_v12  ;;  %v481_v19 = vadd.f32 %v465_v14, %v416_v16  ;;  %v3455_v13 = vld [vmem:[%s4244_s5 + $0x4c] ss:$12 sps:$4 sm:$0xff]  }
  0xf0   :  { %v307_v20 = vpop.f32.mrf.mxu0  ;;  %v2587_v21 = vpop.f32.mrf.mxu1 }
  0xf1   :  { %v466_v22 = vadd.f32 %v307_v20, %v295_v0  ;;  %752 = vmatmul.mubr.bf16.vlgmr.msra.gmra.mxu1 %v534_v18  ;;  %2612 = vmatprep.mubr.bf16.mxu0 %v534_v18  ;;  %v504_v26 = vadd.f32 %v3355_v63, %v481_v19 }
  0xf2   :  { %v311_v23 = vpop.f32.mrf.mxu0  ;;  %v419_v24 = vpop.f32.mrf.mxu1  ;;  %761 = vmatprep.mubr.bf16.mxu1 %v4251_v1  ;;  %2629 = vmatpush3.bf16.msra.mxu1 %v3362_v17 }
  0xf3   :  { %v482_v27 = vadd.f32 %v466_v22, %v419_v24  ;;  %2630 = vmatprep.subr.bf16.mxu1 %v4253_v58  ;;  %v520_v34 = vmax.f32 %v504_v26, 0.0  ;;  %v3470_v22 = vld [vmem:[%s4244_s5 + $0x48] ss:$12 sps:$4 sm:$0xff]  }
  0xf4   :  { %v313_v28 = vpop.f32.mrf.mxu0  ;;  %v3373_v29 = vpop.f32.mrf.mxu1  ;;  %v3476_v26 = vld [vmem:[%s4244_s5 + $0x34] ss:$12 sps:$4 sm:$0xff]  }
  0xf5   :  { %v505_v30 = vadd.f32 %v3355_v63, %v482_v27  ;;  %v467_v31 = vadd.f32 %v313_v28, %v301_v7  ;;  %v3482_v28 = vld [vmem:[%s4244_s5 + $0x8] ss:$12 sps:$4 sm:$0xff]  }
  0xf6   :  { %v315_v32 = vpop.f32.mrf.mxu0  ;;  %2631 = vmatpush3.bf16.msra.mxu1 %v3369_v25  ;;  %v432_v38 = vpop.f32.mrf.mxu1 }
  0xf7   :  { %v521_v35 = vmax.f32 %v505_v30, 0.0  ;;  %v483_v36 = vadd.f32 %v2586_v11, %v467_v31  ;;  %2632 = vmatprep.subr.bf16.mxu1 %v4253_v58 }
  0xf8   :  { %v317_v37 = vpop.f32.mrf.mxu0  ;;  %v2591_v48 = vpop.f32.mrf.mxu1 }
  0xf9   :  { %v468_v40 = vadd.f32 %v317_v37, %v305_v15  ;;  %v535_v41 = vpack.c.bf16 %v521_v35, %v520_v34  ;;  %v506_v45 = vadd.f32 %v3355_v63, %v483_v36  ;;  %v3462_v15 = vld [vmem:[%s4244_s5 + $0x20] ss:$12 sps:$4 sm:$0xff]   ;;  %v3490_v34 = vld [vmem:[%s4244_s5 + $0x30] ss:$12 sps:$4 sm:$0xff]  }
  0xfa   :  { %v321_v43 = vpop.f32.mrf.mxu0  ;;  %2633 = vmatpush3.bf16.msra.mxu1 %v3380_v33  ;;  %v435_v61 = vpop.f32.mrf.mxu1  ;;  %v3497_v37 = vld [vmem:[%s4244_s5 + $0x1c] ss:$12 sps:$4 sm:$0xff]  }
  0xfb   :  { %v484_v46 = vadd.f32 %v2587_v21, %v468_v40  ;;  %762 = vmatmul.mubr.bf16.gmra.mxu1 %v535_v41  ;;  %2613 = vmatmul.mubr.bf16.vlgmr.msra.gmra.mxu0 %v535_v41  ;;  %v522_v55 = vmax.f32 %v506_v45, 0.0 }
  0xfc   :  { %v323_v47 = vpop.f32.mrf.mxu0  ;;  %771 = vmatprep.mubr.bf16.mxu1 %v4251_v1  ;;  %1151 = vmatpush1.bf16.msra.mxu0 %v3386_v39  ;;  %v3442_v9 = vpop.f32.mrf.mxu1 }
  0xfd   :  { %v507_v50 = vadd.f32 %v3355_v63, %v484_v46  ;;  %v469_v51 = vadd.f32 %v323_v47, %v311_v23  ;;  %1152 = vmatprep.subr.bf16.mxu0 %v3391_v42  ;;  %2634 = vmatprep.subr.bf16.mxu1 %v4253_v58  ;;  %v3506_v47 = vld [vmem:[%s4244_s5 + $0x18] ss:$12 sps:$4 sm:$0xff]  }
  0xfe   :  { %v325_v53 = vpop.f32.mrf.mxu0  ;;  %2635 = vmatpush3.bf16.msra.mxu1 %v3397_v44  ;;  %v448_v21 = vpop.f32.mrf.mxu1 }
  0xff   :  { %v523_v56 = vmax.f32 %v507_v50, 0.0  ;;  %v485_v59 = vadd.f32 %v469_v51, %v432_v38  ;;  %2636 = vmatprep.subr.bf16.mxu1 %v4253_v58  ;;  %v3512_v51 = vld [vmem:[%s4244_s5 + $0x4] ss:$12 sps:$4 sm:$0xff]  }
 0x100   :  { %v327_v60 = vpop.f32.mrf.mxu0  ;;  %1153 = vmatpush1.bf16.msra.mxu0 %v3405_v49 }
 0x101   :  { %v470_v0 = vadd.f32 %v327_v60, %v315_v32  ;;  %v536_v2 = vpack.c.bf16 %v523_v56, %v522_v55  ;;  %1154 = vmatprep.subr.bf16.mxu0 %v3412_v52  ;;  %v508_v6 = vadd.f32 %v3355_v63, %v485_v59  ;;  %v2595_v32 = vpop.f32.mrf.mxu1  ;;  %v3520_v60 = vld [vmem:[%s4244_s5] ss:$12 sps:$4 sm:$0xff]  }
 0x102   :  { %v331_v4 = vpop.f32.mrf.mxu0  ;;  %2637 = vmatpush3.bf16.msra.mxu1 %v3419_v54 }
 0x103   :  { %v486_v7 = vadd.f32 %v470_v0, %v435_v61  ;;  %772 = vmatmul.mubr.bf16.gmra.mxu1 %v536_v2  ;;  %2616 = vmatprep.mubr.bf16.mxu0 %v536_v2  ;;  %v524_v16 = vmax.f32 %v508_v6, 0.0  ;;  %v451_v46 = vpop.f32.mrf.mxu1 }
 0x104   :  { %v333_v8 = vpop.f32.mrf.mxu0  ;;  %781 = vmatprep.mubr.bf16.mxu1 %v4251_v1  ;;  %1155 = vmatpush1.bf16.msra.mxu0 %v3426_v62 }
 0x105   :  { %v509_v11 = vadd.f32 %v3355_v63, %v486_v7  ;;  %v471_v12 = vadd.f32 %v333_v8, %v321_v43  ;;  %1156 = vmatprep.subr.bf16.mxu0 %v3432_v3  ;;  %2638 = vmatprep.subr.bf16.mxu1 %v4253_v58 }
 0x106   :  { %v335_v14 = vpop.f32.mrf.mxu0  ;;  %2639 = vmatpush3.bf16.msra.mxu1 %v3438_v5 }
 0x107   :  { %v525_v18 = vmax.f32 %v509_v11, 0.0  ;;  %v487_v19 = vadd.f32 %v3373_v29, %v471_v12  ;;  %2640 = vmatprep.subr.bf16.mxu1 %v4253_v58 }
 0x108   :  { %v337_v20 = vpop.f32.mrf.mxu0  ;;  %1157 = vmatpush1.bf16.msra.mxu0 %v3448_v10 }
 0x109   :  { %v472_v23 = vadd.f32 %v337_v20, %v325_v53  ;;  %v537_v24 = vpack.c.bf16 %v525_v18, %v524_v16  ;;  %1158 = vmatprep.subr.bf16.mxu0 %v3455_v13  ;;  %v510_v29 = vadd.f32 %v3355_v63, %v487_v19 }
 0x10a   :  { %v341_v27 = vpop.f32.mrf.mxu0  ;;  %2641 = vmatpush3.bf16.msra.mxu1 %v3462_v15 }
 0x10b   :  { %v488_v30 = vadd.f32 %v2591_v48, %v472_v23  ;;  %782 = vmatmul.mubr.bf16.gmra.mxu1 %v537_v24  ;;  %2617 = vmatmul.mubr.bf16.gmra.mxu0 %v537_v24  ;;  %v526_v40 = vmax.f32 %v510_v29, 0.0 }
 0x10c   :  { %v343_v31 = vpop.f32.mrf.mxu0  ;;  %791 = vmatprep.mubr.bf16.mxu1 %v4251_v1  ;;  %1159 = vmatpush1.bf16.msra.mxu0 %v3470_v22 }
 0x10d   :  { %v511_v35 = vadd.f32 %v3355_v63, %v488_v30  ;;  %v473_v36 = vadd.f32 %v343_v31, %v331_v4  ;;  %1160 = vmatprep.subr.bf16.mxu0 %v3476_v26  ;;  %2642 = vmatprep.subr.bf16.mxu1 %v4253_v58 }
 0x10e   :  { %v345_v38 = vpop.f32.mrf.mxu0  ;;  %2643 = vmatpush3.bf16.msra.mxu1 %v3482_v28 }
 0x10f   :  { %v527_v41 = vmax.f32 %v511_v35, 0.0  ;;  %v489_v43 = vadd.f32 %v473_v36, %v448_v21  ;;  %2648 = vmatprep.subr.bf16.mxu1 %v4253_v58 }
 0x110   :  { %v347_v45 = vpop.f32.mrf.mxu0  ;;  %1161 = vmatpush1.bf16.msra.mxu0 %v3490_v34 }
 0x111   :  { %v474_v48 = vadd.f32 %v347_v45, %v335_v14  ;;  %v538_v50 = vpack.c.bf16 %v527_v41, %v526_v40  ;;  %1162 = vmatprep.subr.bf16.mxu0 %v3497_v37  ;;  %v512_v55 = vadd.f32 %v3355_v63, %v489_v43 }
 0x112   :  { %v351_v53 = vpop.f32.mrf.mxu0 }
 0x113   :  { %v490_v56 = vadd.f32 %v474_v48, %v451_v46  ;;  %792 = vmatmul.mubr.bf16.gmra.mxu1 %v538_v50  ;;  %2620 = vmatprep.mubr.bf16.mxu0 %v538_v50  ;;  %v528_v4 = vmax.f32 %v512_v55, 0.0  ;;  %v574_v50 = vld [vmem:[%s4246_s4] sm:$0x7] }
 0x114   :  { %v353_v59 = vpop.f32.mrf.mxu0  ;;  %801 = vmatprep.mubr.bf16.mxu1 %v4251_v1  ;;  %1163 = vmatpush1.bf16.msra.mxu0 %v3506_v47 }
 0x115   :  { %v513_v61 = vadd.f32 %v3355_v63, %v490_v56  ;;  %v475_v0 = vadd.f32 %v353_v59, %v341_v27  ;;  %1164 = vmatprep.subr.bf16.mxu0 %v3512_v51 }
 0x116   :  { %v355_v2 = vpop.f32.mrf.mxu0 }
 0x117   :  { %v529_v6 = vmax.f32 %v513_v61, 0.0  ;;  %v491_v7 = vadd.f32 %v3442_v9, %v475_v0 }
 0x118   :  { %v357_v8 = vpop.f32.mrf.mxu0  ;;  %1165 = vmatpush1.bf16.msra.mxu0 %v3520_v60 }
 0x119   :  { %v476_v11 = vadd.f32 %v357_v8, %v345_v38  ;;  %v539_v12 = vpack.c.bf16 %v529_v6, %v528_v4  ;;  %1285 = vmatprep.subr.bf16.mxu0 %v3348_v57  ;;  %v514_v16 = vadd.f32 %v3355_v63, %v491_v7 }
 0x11a   :  { %v361_v14 = vpop.f32.mrf.mxu0 }
 0x11b   :  { %v492_v18 = vadd.f32 %v2595_v32, %v476_v11  ;;  %802 = vmatmul.mubr.bf16.gmra.mxu1 %v539_v12  ;;  %2621 = vmatmul.mubr.bf16.gmra.mxu0 %v539_v12  ;;  %v530_v23 = vmax.f32 %v514_v16, 0.0 }
 0x11c   :  { %v362_v19 = vpop.f32.mrf.mxu0  ;;  %811 = vmatprep.mubr.bf16.mxu1 %v4251_v1 }
 0x11d   :  { %v515_v20 = vadd.f32 %v3355_v63, %v492_v18  ;;  %v477_v21 = vadd.f32 %v362_v19, %v351_v53 }
 0x11e   :  { %v364_v9 = vpop.f32.mrf.mxu0 }
 0x11f   :  { %v531_v24 = vmax.f32 %v515_v20, 0.0  ;;  %v516_v29 = vadd.f32 %v3355_v63, %v477_v21 }
 0x120   :  { %v365_v27 = vpop.f32.mrf.mxu0 }
 0x121   :  { %v478_v30 = vadd.f32 %v365_v27, %v355_v2  ;;  %v540_v31 = vpack.c.bf16 %v531_v24, %v530_v23  ;;  %v532_v32 = vmax.f32 %v516_v29, 0.0 }
 0x123   :  { %v517_v35 = vadd.f32 %v3355_v63, %v478_v30  ;;  %812 = vmatmul.mubr.bf16.gmra.mxu1 %v540_v31  ;;  %2624 = vmatprep.mubr.bf16.mxu0 %v540_v31  ;;  %v576_v63 = vlaneseq }
 0x124   :  { %821 = vmatprep.mubr.bf16.mxu1 %v4251_v1 }
 0x125   :  { %v533_v36 = vmax.f32 %v517_v35, 0.0  ;;  %v577_v41 = vshrl.u32 %v576_v63, 7 }
 0x127   :  { %v541_v38 = vpack.c.bf16 %v533_v36, %v532_v32  ;;  %v586_v45 = vsub.s32 2, %v577_v41  ;;  %v578_v48 = vsub.s32 0, %v577_v41  ;;  %v582_v53 = vsub.s32 1, %v577_v41 }
 0x129   :  { %2625 = vmatmul.mubr.bf16.gmra.mxu0 %v541_v38  ;;  %v3582_v55 = vrot.slane %v574_v50, %v586_v45  ;;  %v3586_v59 = vrot.slane %v574_v50, %v578_v48  ;;  %v3588_v2 = vrot.slane %v574_v50, %v582_v53 }
 0x12a   :  { %1182 = vmatprep.mubr.bf16.mxu0 %v4251_v1 }
 0x12b   :  { %822 = vmatmul.mubr.bf16.gmra.mxu1 %v541_v38 }
 0x12c   :  { %2644 = vmatprep.mubr.msk.bf16.mxu1 %vm3117_vm0, %v4253_v58 }
 0x131   :  { %1183 = vmatmul.mubr.bf16.vlgmr.msra.gmra.mxu0 %v4251_v1 }
 0x132   :  { %1286 = vmatpush1.bf16.msra.mxu0 %v3386_v39  ;;  %1317 = vmatprep.mubr.bf16.mxu0 %v4251_v1 }
 0x133   :  { %2645 = vmatmul.mubr.bf16.vlgmr.msra.gmra.mxu1 %v4251_v1  ;;  %1287 = vmatprep.subr.bf16.mxu0 %v3391_v42 }
 0x134   :  { %2649 = vmatpush3.bf16.msra.mxu1 %v3362_v17  ;;  %2664 = vmatprep.mubr.msk.bf16.mxu1 %vm3117_vm0, %v4253_v58 }
 0x135   :  { %2650 = vmatprep.subr.bf16.mxu1 %v4253_v58 }
 0x136   :  { %1288 = vmatpush1.bf16.msra.mxu0 %v3405_v49 }
 0x137   :  { %1289 = vmatprep.subr.bf16.mxu0 %v3412_v52 }
 0x138   :  { %2651 = vmatpush3.bf16.msra.mxu1 %v3369_v25 }
 0x139   :  { %2652 = vmatprep.subr.bf16.mxu1 %v4253_v58 }
 0x13a   :  { %1290 = vmatpush1.bf16.msra.mxu0 %v3426_v62 }
 0x13b   :  { %1291 = vmatprep.subr.bf16.mxu0 %v3432_v3 }
 0x13c   :  { %2653 = vmatpush3.bf16.msra.mxu1 %v3380_v33 }
 0x13d   :  { %2654 = vmatprep.subr.bf16.mxu1 %v4253_v58 }
 0x13e   :  { %1292 = vmatpush1.bf16.msra.mxu0 %v3448_v10 }
 0x13f   :  { %1293 = vmatprep.subr.bf16.mxu0 %v3455_v13 }
 0x140   :  { %2655 = vmatpush3.bf16.msra.mxu1 %v3397_v44 }
 0x141   :  { %2656 = vmatprep.subr.bf16.mxu1 %v4253_v58 }
 0x142   :  { %1294 = vmatpush1.bf16.msra.mxu0 %v3470_v22 }
 0x143   :  { %1295 = vmatprep.subr.bf16.mxu0 %v3476_v26 }
 0x144   :  { %2657 = vmatpush3.bf16.msra.mxu1 %v3419_v54 }
 0x145   :  { %2658 = vmatprep.subr.bf16.mxu1 %v4253_v58 }
 0x146   :  { %1296 = vmatpush1.bf16.msra.mxu0 %v3490_v34 }
 0x147   :  { %1297 = vmatprep.subr.bf16.mxu0 %v3497_v37 }
 0x148   :  { %2659 = vmatpush3.bf16.msra.mxu1 %v3438_v5 }
 0x149   :  { %2660 = vmatprep.subr.bf16.mxu1 %v4253_v58 }
 0x14a   :  { %1298 = vmatpush1.bf16.msra.mxu0 %v3506_v47 }
 0x14b   :  { %1299 = vmatprep.subr.bf16.mxu0 %v3512_v51 }
 0x14c   :  { %2661 = vmatpush3.bf16.msra.mxu1 %v3462_v15 }
 0x14d   :  { %2662 = vmatprep.subr.bf16.mxu1 %v4253_v58 }
 0x14e   :  { %1300 = vmatpush1.bf16.msra.mxu0 %v3520_v60 }
 0x14f   :  { %1420 = vmatprep.subr.bf16.mxu0 %v3348_v57 }
 0x150   :  { %2663 = vmatpush3.bf16.msra.mxu1 %v3482_v28 }
 0x151   :  { %2668 = vmatprep.subr.bf16.mxu1 %v4253_v58 }
 0x1b1   :  { %v3573_v40 = vpop.f32.mrf.mxu1 }
 0x1b3   :  { %v3575_v43 = vpop.f32.mrf.mxu1 }
 0x1b5   :  { %v3577_v46 = vpop.f32.mrf.mxu1 }
 0x1b7   :  { %v3584_v56 = vpop.f32.mrf.mxu1 }
 0x1bb   :  { %v763_v61 = vpop.f32.mrf.mxu1  ;;  %v2614_v0 = vpop.f32.mrf.mxu0 }
 0x1bc   :  { %v3591_v4 = vadd.f32 %v763_v61, %v3586_v59  ;;  %v3594_v6 = vadd.f32 %v2614_v0, %v3582_v55 }
 0x1bd   :  { %v765_v7 = vpop.f32.mrf.mxu1  ;;  %v3596_v8 = vpop.f32.mrf.mxu0 }
 0x1be   :  { %v3599_v11 = vadd.f32 %v765_v7, %v3588_v2 }
 0x1bf   :  { %v767_v12 = vpop.f32.mrf.mxu1  ;;  %v2615_v14 = vpop.f32.mrf.mxu0 }
 0x1c0   :  { %v3602_v16 = vadd.f32 %v767_v12, %v3586_v59  ;;  %v3605_v18 = vadd.f32 %v2615_v14, %v3582_v55 }
 0x1c1   :  { %v769_v19 = vpop.f32.mrf.mxu1  ;;  %v3619_v30 = vpop.f32.mrf.mxu0 }
 0x1c2   :  { %v3608_v20 = vadd.f32 %v769_v19, %v3588_v2 }
 0x1c3   :  { %v773_v21 = vpop.f32.mrf.mxu1 }
 0x1c4   :  { %v3611_v9 = vadd.f32 %v773_v21, %v3586_v59 }
 0x1c5   :  { %v775_v23 = vpop.f32.mrf.mxu1 }
 0x1c6   :  { %v3614_v24 = vadd.f32 %v775_v23, %v3588_v2 }
 0x1c7   :  { %v777_v27 = vpop.f32.mrf.mxu1 }
 0x1c8   :  { %v3617_v29 = vadd.f32 %v777_v27, %v3586_v59 }
 0x1c9   :  { %v779_v31 = vpop.f32.mrf.mxu1 }
 0x1ca   :  { %v3622_v35 = vadd.f32 %v779_v31, %v3588_v2 }
 0x1cb   :  { %v783_v32 = vpop.f32.mrf.mxu1  ;;  %v2618_v36 = vpop.f32.mrf.mxu0 }
 0x1cc   :  { %v3625_v38 = vadd.f32 %v783_v32, %v3586_v59  ;;  %v3628_v63 = vadd.f32 %v2618_v36, %v3582_v55 }
 0x1cd   :  { %v785_v41 = vpop.f32.mrf.mxu1  ;;  %v882_v45 = vpop.f32.mrf.mxu0 }
 0x1ce   :  { %4255 = vst [vmem:[#allocation3_spill] sm:$0xff] %v3628_v63  ;;  %v3631_v48 = vadd.f32 %v785_v41, %v3588_v2  ;;  %v3634_v50 = vadd.f32 %v882_v45, %v3582_v55 }
 0x1cf   :  { %v787_v53 = vpop.f32.mrf.mxu1  ;;  %v2619_v61 = vpop.f32.mrf.mxu0 }
 0x1d0   :  { %v3637_v0 = vadd.f32 %v787_v53, %v3586_v59  ;;  %v3640_v7 = vadd.f32 %v2619_v61, %v3582_v55 }
 0x1d1   :  { %v789_v12 = vpop.f32.mrf.mxu1  ;;  %v885_v14 = vpop.f32.mrf.mxu0 }
 0x1d2   :  { %4256 = vst [vmem:[#allocation4_spill] sm:$0xff] %v3640_v7  ;;  %v3643_v19 = vadd.f32 %v789_v12, %v3588_v2  ;;  %v3646_v21 = vadd.f32 %v885_v14, %v3582_v55 }
 0x1d3   :  { %v793_v23 = vpop.f32.mrf.mxu1 }
 0x1d4   :  { %4257 = vst [vmem:[#allocation5_spill] sm:$0xff] %v3643_v19  ;;  %v3649_v27 = vadd.f32 %v793_v23, %v3586_v59 }
 0x1d5   :  { %v795_v31 = vpop.f32.mrf.mxu1 }
 0x1d6   :  { %4258 = vst [vmem:[#allocation6_spill] sm:$0xff] %v3649_v27  ;;  %v3652_v32 = vadd.f32 %v795_v31, %v3588_v2 }
 0x1d7   :  { %v797_v36 = vpop.f32.mrf.mxu1 }
 0x1d8   :  { %4259 = vst [vmem:[#allocation7_spill] sm:$0xff] %v3652_v32  ;;  %v3655_v41 = vadd.f32 %v797_v36, %v3586_v59 }
 0x1d9   :  { %v799_v45 = vpop.f32.mrf.mxu1 }
 0x1da   :  { %4260 = vst [vmem:[#allocation8_spill] sm:$0xff] %v3655_v41  ;;  %v3658_v53 = vadd.f32 %v799_v45, %v3588_v2 }
 0x1db   :  { %v803_v61 = vpop.f32.mrf.mxu1  ;;  %v2622_v12 = vpop.f32.mrf.mxu0 }
 0x1dc   :  { %4261 = vst [vmem:[#allocation9_spill] sm:$0xff] %v3658_v53  ;;  %v3661_v14 = vadd.f32 %v803_v61, %v3586_v59  ;;  %v3664_v23 = vadd.f32 %v2622_v12, %v3582_v55 }
 0x1dd   :  { %v805_v1 = vpop.f32.mrf.mxu1  ;;  %v898_v58 = vpop.f32.mrf.mxu0 }
 0x1de   :  { %4262 = vst [vmem:[#allocation10_spill] sm:$0xff] %v3661_v14  ;;  %4263 = vst [vmem:[#allocation11_spill] sm:$0xff] %v3664_v23  ;;  %v3667_v31 = vadd.f32 %v805_v1, %v3588_v2  ;;  %v3670_v36 = vadd.f32 %v898_v58, %v3582_v55 }
 0x1df   :  { %v807_v32 = vpop.f32.mrf.mxu1  ;;  %v2623_v41 = vpop.f32.mrf.mxu0 }
 0x1e0   :  { %4264 = vst [vmem:[#allocation12_spill] sm:$0xff] %v3667_v31  ;;  %4265 = vst [vmem:[#allocation13_spill] sm:$0xff] %v3670_v36  ;;  %v3673_v45 = vadd.f32 %v807_v32, %v3586_v59  ;;  %v3676_v53 = vadd.f32 %v2623_v41, %v3582_v55 }
 0x1e1   :  { %v809_v61 = vpop.f32.mrf.mxu1  ;;  %v901_v14 = vpop.f32.mrf.mxu0 }
 0x1e2   :  { %4266 = vst [vmem:[#allocation14_spill] sm:$0xff] %v3673_v45  ;;  %4267 = vst [vmem:[#allocation15_spill] sm:$0xff] %v3676_v53  ;;  %v3679_v12 = vadd.f32 %v809_v61, %v3588_v2  ;;  %v3682_v23 = vadd.f32 %v901_v14, %v3582_v55 }
 0x1e3   :  { %v813_v1 = vpop.f32.mrf.mxu1 }
 0x1e4   :  { %4268 = vst [vmem:[#allocation16_spill] sm:$0xff] %v3679_v12  ;;  %4269 = vst [vmem:[#allocation17_spill] sm:$0xff] %v3682_v23  ;;  %v3685_v58 = vadd.f32 %v813_v1, %v3586_v59 }
 0x1e5   :  { %v815_v31 = vpop.f32.mrf.mxu1 }
 0x1e6   :  { %4270 = vst [vmem:[#allocation18_spill] sm:$0xff] %v3685_v58  ;;  %v3688_v36 = vadd.f32 %v815_v31, %v3588_v2 }
 0x1e7   :  { %v817_v32 = vpop.f32.mrf.mxu1 }
 0x1e8   :  { %4271 = vst [vmem:[#allocation19_spill] sm:$0xff] %v3688_v36  ;;  %v3691_v41 = vadd.f32 %v817_v32, %v3586_v59 }
 0x1e9   :  { %v819_v53 = vpop.f32.mrf.mxu1  ;;  %v2626_v45 = vpop.f32.mrf.mxu0 }
 0x1ea   :  { %4272 = vst [vmem:[#allocation20_spill] sm:$0xff] %v3691_v41  ;;  %v3694_v61 = vadd.f32 %v819_v53, %v3588_v2  ;;  %v3697_v14 = vadd.f32 %v2626_v45, %v3582_v55  ;;  %v754_v45 = vadd.f32 %v3573_v40, %v3586_v59 }
 0x1eb   :  { %v823_v12 = vpop.f32.mrf.mxu1  ;;  %v914_v23 = vpop.f32.mrf.mxu0 }
 0x1ec   :  { %4273 = vst [vmem:[#allocation21_spill] sm:$0xff] %v3694_v61  ;;  %4274 = vst [vmem:[#allocation22_spill] sm:$0xff] %v3697_v14  ;;  %v3700_v1 = vadd.f32 %v823_v12, %v3586_v59  ;;  %v3703_v31 = vadd.f32 %v914_v23, %v3582_v55 }
 0x1ed   :  { %v825_v36 = vpop.f32.mrf.mxu1  ;;  %v2627_v58 = vpop.f32.mrf.mxu0 }
 0x1ee   :  { %4275 = vst [vmem:[#allocation23_spill] sm:$0xff] %v3700_v1  ;;  %4276 = vst [vmem:[#allocation24_spill] sm:$0xff] %v3703_v31  ;;  %v3706_v32 = vadd.f32 %v825_v36, %v3588_v2  ;;  %v3709_v41 = vadd.f32 %v2627_v58, %v3582_v55 }
 0x1ef   :  { %v827_v53 = vpop.f32.mrf.mxu1  ;;  %v917_v61 = vpop.f32.mrf.mxu0 }
 0x1f0   :  { %4277 = vst [vmem:[#allocation25_spill] sm:$0xff] %v3706_v32  ;;  %4278 = vst [vmem:[#allocation26_spill] sm:$0xff] %v3709_v41  ;;  %v3714_v14 = vadd.f32 %v827_v53, %v3586_v59  ;;  %v3717_v12 = vadd.f32 %v917_v61, %v3582_v55  ;;  %v758_v41 = vadd.f32 %v3577_v46, %v3586_v59 }
 0x1f1   :  { %v829_v23 = vpop.f32.mrf.mxu1  ;;  %v1184_v1 = vpop.f32.mrf.mxu0  ;;  %v756_v53 = vadd.f32 %v3575_v43, %v3588_v2 }
 0x1f2   :  { %4279 = vst [vmem:[#allocation27_spill] sm:$0xff] %v3714_v14  ;;  %4280 = vst [vmem:[#allocation28_spill] sm:$0xff] %v3717_v12  ;;  %v3720_v31 = vadd.f32 %v829_v23, %v3588_v2  ;;  %v1234_v36 = vadd.f32 %v1184_v1, %v754_v45  ;;  %v760_v1 = vadd.f32 %v3584_v56, %v3588_v2 }
 0x1f3   :  { %v1186_v32 = vpop.f32.mrf.mxu0  ;;  %v1227_v58 = vpop.f32.mrf.mxu1 }
 0x1f4   :  { %4281 = vst [vmem:[#allocation29_spill] sm:$0xff] %v3720_v31  ;;  %v2409_v27 = vmul.f32 -1.442695, %v1234_v36  ;;  %v1235_v12 = vadd.f32 %v1186_v32, %v756_v53 }
 0x1f5   :  { %v1188_v7 = vpop.f32.mrf.mxu0  ;;  %v2646_v40 = vpop.f32.mrf.mxu1 }
 0x1f6   :  { %2930 = vpow2.f32 %v2409_v27  ;;  %v1236_v61 = vadd.f32 %v1188_v7, %v758_v41  ;;  %v2410_v31 = vmul.f32 -1.442695, %v1235_v12  ;;  %v3731_v41 = vld [vmem:[%s4247_s6] ss:$0 sm:$0xff] }
 0x1f7   :  { %v1230_v14 = vpop.f32.mrf.mxu1  ;;  %v1190_v19 = vpop.f32.mrf.mxu0 }
 0x1f8   :  { %v2411_v63 = vmul.f32 -1.442695, %v1236_v61  ;;  %v1237_v23 = vadd.f32 %v1190_v19, %v760_v1  ;;  %v1263_v53 = vadd.f32 %v3731_v41, %v1230_v14  ;;  %v870_v1 = vadd.f32 %v3619_v30, %v3582_v55 }
 0x1f9   :  { %v2647_v45 = vpop.f32.mrf.mxu1  ;;  %v4282_v30 = vmov 0.0  }
 0x1fa   :  { %2932 = vpow2.f32 %v2411_v63  ;;  %v2412_v46 = vmul.f32 -1.442695, %v1237_v23  ;;  %v1262_v63 = vadd.f32 %v3731_v41, %v1227_v58 }
 0x1fb   :  { %2934 = vpow2.f32 %v2410_v31  ;;  %v867_v31 = vadd.f32 %v3596_v8, %v3582_v55 }
 0x1fc   :  { %2936 = vpow2.f32 %v2412_v46 }
 0x203   :  { %v2931_v59 = vpop.eup %2930 }
 0x204   :  { %v1250_v36 = vadd.f32 1.0, %v2931_v59 }
 0x206   :  { %2938 = vrcp.f32 %v1250_v36 }
 0x207   :  { %v2933_v43 = vpop.eup %2932 }
 0x208   :  { %v1252_v27 = vadd.f32 1.0, %v2933_v43  ;;  %v2935_v7 = vpop.eup %2934 }
 0x209   :  { %v2937_v56 = vpop.eup %2936  ;;  %v1251_v2 = vadd.f32 1.0, %v2935_v7 }
 0x20a   :  { %2940 = vrcp.f32 %v1252_v27  ;;  %v1253_v32 = vadd.f32 1.0, %v2937_v56 }
 0x20b   :  { %2942 = vrcp.f32 %v1251_v2 }
 0x20c   :  { %2944 = vrcp.f32 %v1253_v32 }
 0x213   :  { %v2939_v19 = vpop.eup %2938 }
 0x214   :  { %v1264_v12 = vmul.f32 %v2939_v19, %v1262_v63  ;;  %v4283_v19 = vmov 0  }
 0x216   :  { %v1266_v40 = vadd.f32 %v1264_v12, %v867_v31 }
 0x217   :  { %v2941_v61 = vpop.eup %2940 }
 0x218   :  { %2946 = vtanh.f32 %v1266_v40  ;;  %v1265_v45 = vmul.f32 %v2941_v61, %v1263_v53  ;;  %v2943_v58 = vpop.eup %2942 }
 0x219   :  { %v2945_v46 = vpop.eup %2944  ;;  %v1270_v59 = vsub.f32 1.0, %v2943_v58  ;;  %v1274_v8 = vmul.f32 0.0, %v2943_v58 }
 0x21a   :  { %v1267_v23 = vadd.f32 %v1265_v45, %v870_v1  ;;  %v1271_v27 = vsub.f32 1.0, %v2945_v46  ;;  %v1275_v2 = vmul.f32 0.0, %v2945_v46 }
 0x21c   :  { %2948 = vtanh.f32 %v1267_v23 }
 0x225   :  { %v2947_v36 = vpop.eup %2946 }
 0x226   :  { %v1272_v43 = vmul.f32 %v2947_v36, %v1270_v59 }
 0x228   :  { %v3739_v7 = vadd.f32 %v1274_v8, %v1272_v43 }
 0x229   :  { %v2949_v56 = vpop.eup %2948 }
 0x22a   :  { %v1273_v14 = vmul.f32 %v2949_v56, %v1271_v27 }
 0x22c   :  { %v3741_v63 = vadd.f32 %v1275_v2, %v1273_v14 }
 0x22e   :  { %v1284_v55 = vpack.c.bf16 %v3741_v63, %v3739_v7 }
 0x230   :  { %1318 = vmatmul.mubr.bf16.vlgmr.msra.gmra.mxu0 %v1284_v55  ;;  %2665 = vmatmul.mubr.bf16.vlgmr.msra.gmra.mxu1 %v1284_v55 }
 0x231   :  { %1421 = vmatpush1.bf16.msra.mxu0 %v3386_v39  ;;  %2669 = vmatpush3.bf16.msra.mxu1 %v3362_v17 }
 0x232   :  { %1422 = vmatprep.subr.bf16.mxu0 %v3391_v42  ;;  %2670 = vmatprep.subr.bf16.mxu1 %v4282_v30 }
 0x233   :  { %1452 = vmatprep.mubr.bf16.mxu0 %v4283_v19  ;;  %2684 = vmatprep.mubr.msk.bf16.mxu1 %vm3117_vm0, %v4282_v30 }
 0x235   :  { %1423 = vmatpush1.bf16.msra.mxu0 %v3405_v49  ;;  %2671 = vmatpush3.bf16.msra.mxu1 %v3369_v25 }
 0x236   :  { %1424 = vmatprep.subr.bf16.mxu0 %v3412_v52  ;;  %2672 = vmatprep.subr.bf16.mxu1 %v4282_v30 }
 0x239   :  { %1425 = vmatpush1.bf16.msra.mxu0 %v3426_v62  ;;  %2673 = vmatpush3.bf16.msra.mxu1 %v3380_v33 }
 0x23a   :  { %1426 = vmatprep.subr.bf16.mxu0 %v3432_v3  ;;  %2674 = vmatprep.subr.bf16.mxu1 %v4282_v30 }
 0x23d   :  { %1427 = vmatpush1.bf16.msra.mxu0 %v3448_v10  ;;  %2675 = vmatpush3.bf16.msra.mxu1 %v3397_v44 }
 0x23e   :  { %1428 = vmatprep.subr.bf16.mxu0 %v3455_v13  ;;  %2676 = vmatprep.subr.bf16.mxu1 %v4282_v30 }
 0x241   :  { %1429 = vmatpush1.bf16.msra.mxu0 %v3470_v22  ;;  %2677 = vmatpush3.bf16.msra.mxu1 %v3419_v54 }
 0x242   :  { %1430 = vmatprep.subr.bf16.mxu0 %v3476_v26  ;;  %2678 = vmatprep.subr.bf16.mxu1 %v4282_v30 }
 0x245   :  { %1431 = vmatpush1.bf16.msra.mxu0 %v3490_v34  ;;  %2679 = vmatpush3.bf16.msra.mxu1 %v3438_v5 }
 0x246   :  { %1432 = vmatprep.subr.bf16.mxu0 %v3497_v37  ;;  %2680 = vmatprep.subr.bf16.mxu1 %v4282_v30 }
 0x249   :  { %1433 = vmatpush1.bf16.msra.mxu0 %v3506_v47  ;;  %2681 = vmatpush3.bf16.msra.mxu1 %v3462_v15 }
 0x24a   :  { %1434 = vmatprep.subr.bf16.mxu0 %v3512_v51  ;;  %2682 = vmatprep.subr.bf16.mxu1 %v4282_v30 }
 0x24d   :  { %1435 = vmatpush1.bf16.msra.mxu0 %v3520_v60  ;;  %2683 = vmatpush3.bf16.msra.mxu1 %v3482_v28 }
 0x24e   :  { %1555 = vmatprep.subr.bf16.mxu0 %v3348_v57  ;;  %2688 = vmatprep.subr.bf16.mxu1 %v4282_v30 }
 0x2f0   :  { %v1319_v32 = vpop.f32.mrf.mxu0  ;;  %v1362_v31 = vpop.f32.mrf.mxu1 }
 0x2f1   :  { %v1369_v12 = vadd.f32 %v1319_v32, %v3591_v4 }
 0x2f2   :  { %v1321_v40 = vpop.f32.mrf.mxu0  ;;  %v2666_v53 = vpop.f32.mrf.mxu1 }
 0x2f3   :  { %v2413_v61 = vmul.f32 -1.442695, %v1369_v12  ;;  %v1370_v46 = vadd.f32 %v1321_v40, %v3599_v11  ;;  %v1397_v11 = vadd.f32 %v3731_v41, %v1362_v31 }
 0x2f4   :  { %v1323_v1 = vpop.f32.mrf.mxu0  ;;  %v1365_v45 = vpop.f32.mrf.mxu1 }
 0x2f5   :  { %2950 = vpow2.f32 %v2413_v61  ;;  %v1371_v23 = vadd.f32 %v1323_v1, %v3602_v16  ;;  %v2414_v43 = vmul.f32 -1.442695, %v1370_v46  ;;  %v1398_v53 = vadd.f32 %v3731_v41, %v1365_v45 }
 0x2f6   :  { %v2667_v58 = vpop.f32.mrf.mxu1  ;;  %v1325_v36 = vpop.f32.mrf.mxu0 }
 0x2f7   :  { %v2415_v59 = vmul.f32 -1.442695, %v1371_v23  ;;  %v1372_v57 = vadd.f32 %v1325_v36, %v3608_v20 }
 0x2f9   :  { %2952 = vpow2.f32 %v2415_v59  ;;  %v2416_v8 = vmul.f32 -1.442695, %v1372_v57 }
 0x2fa   :  { %2954 = vpow2.f32 %v2414_v43 }
 0x2fb   :  { %2956 = vpow2.f32 %v2416_v8 }
 0x302   :  { %v2951_v4 = vpop.eup %2950 }
 0x303   :  { %v1385_v27 = vadd.f32 1.0, %v2951_v4 }
 0x305   :  { %2958 = vrcp.f32 %v1385_v27 }
 0x306   :  { %v2953_v56 = vpop.eup %2952 }
 0x307   :  { %v1387_v14 = vadd.f32 1.0, %v2953_v56  ;;  %v2955_v2 = vpop.eup %2954 }
 0x308   :  { %v2957_v16 = vpop.eup %2956  ;;  %v1386_v55 = vadd.f32 1.0, %v2955_v2 }
 0x309   :  { %2960 = vrcp.f32 %v1387_v14  ;;  %v1388_v12 = vadd.f32 1.0, %v2957_v16 }
 0x30a   :  { %2962 = vrcp.f32 %v1386_v55 }
 0x30b   :  { %2964 = vrcp.f32 %v1388_v12 }
 0x312   :  { %v2959_v32 = vpop.eup %2958 }
 0x313   :  { %v1399_v40 = vmul.f32 %v2959_v32, %v1397_v11 }
 0x315   :  { %v1401_v20 = vadd.f32 %v1399_v40, %v3594_v6 }
 0x316   :  { %v2961_v61 = vpop.eup %2960 }
 0x317   :  { %2966 = vtanh.f32 %v1401_v20  ;;  %v1400_v1 = vmul.f32 %v2961_v61, %v1398_v53  ;;  %v2963_v58 = vpop.eup %2962 }
 0x318   :  { %v2965_v46 = vpop.eup %2964  ;;  %v1405_v59 = vsub.f32 1.0, %v2963_v58  ;;  %v1409_v57 = vmul.f32 %v2963_v58, %v3739_v7 }
 0x319   :  { %v1402_v23 = vadd.f32 %v1400_v1, %v3605_v18  ;;  %v1406_v43 = vsub.f32 1.0, %v2965_v46  ;;  %v1410_v45 = vmul.f32 %v2965_v46, %v3741_v63 }
 0x31b   :  { %2968 = vtanh.f32 %v1402_v23 }
 0x324   :  { %v2967_v36 = vpop.eup %2966 }
 0x325   :  { %v1407_v31 = vmul.f32 %v2967_v36, %v1405_v59 }
 0x327   :  { %v3789_v8 = vadd.f32 %v1409_v57, %v1407_v31 }
 0x328   :  { %v2969_v6 = vpop.eup %2968 }
 0x329   :  { %v1408_v4 = vmul.f32 %v2969_v6, %v1406_v43 }
 0x32b   :  { %v3792_v27 = vadd.f32 %v1410_v45, %v1408_v4 }
 0x32d   :  { %v1419_v18 = vpack.c.bf16 %v3792_v27, %v3789_v8 }
 0x32f   :  { %1453 = vmatmul.mubr.bf16.vlgmr.msra.gmra.mxu0 %v1419_v18  ;;  %2685 = vmatmul.mubr.bf16.vlgmr.msra.gmra.mxu1 %v1419_v18 }
 0x330   :  { %1556 = vmatpush1.bf16.msra.mxu0 %v3386_v39  ;;  %2689 = vmatpush3.bf16.msra.mxu1 %v3362_v17  ;;  %v3832_v17 = vld [vmem:[%s4244_s5 + $0xac] ss:$12 sps:$4 sm:$0xff]  }
 0x331   :  { %1557 = vmatprep.subr.bf16.mxu0 %v3391_v42  ;;  %2690 = vmatprep.subr.bf16.mxu1 %v4282_v30 }
 0x332   :  { %1587 = vmatprep.mubr.bf16.mxu0 %v4283_v19  ;;  %2704 = vmatprep.mubr.msk.bf16.mxu1 %vm3117_vm0, %v4282_v30 }
 0x334   :  { %1558 = vmatpush1.bf16.msra.mxu0 %v3405_v49  ;;  %2691 = vmatpush3.bf16.msra.mxu1 %v3369_v25 }
 0x335   :  { %1559 = vmatprep.subr.bf16.mxu0 %v3412_v52  ;;  %2692 = vmatprep.subr.bf16.mxu1 %v4282_v30 }
 0x338   :  { %1560 = vmatpush1.bf16.msra.mxu0 %v3426_v62  ;;  %2693 = vmatpush3.bf16.msra.mxu1 %v3380_v33 }
 0x339   :  { %1561 = vmatprep.subr.bf16.mxu0 %v3432_v3  ;;  %2694 = vmatprep.subr.bf16.mxu1 %v4282_v30 }
 0x33c   :  { %1562 = vmatpush1.bf16.msra.mxu0 %v3448_v10  ;;  %2695 = vmatpush3.bf16.msra.mxu1 %v3397_v44 }
 0x33d   :  { %1563 = vmatprep.subr.bf16.mxu0 %v3455_v13  ;;  %2696 = vmatprep.subr.bf16.mxu1 %v4282_v30 }
 0x340   :  { %1564 = vmatpush1.bf16.msra.mxu0 %v3470_v22  ;;  %2697 = vmatpush3.bf16.msra.mxu1 %v3419_v54 }
 0x341   :  { %1565 = vmatprep.subr.bf16.mxu0 %v3476_v26  ;;  %2698 = vmatprep.subr.bf16.mxu1 %v4282_v30 }
 0x344   :  { %1566 = vmatpush1.bf16.msra.mxu0 %v3490_v34  ;;  %2699 = vmatpush3.bf16.msra.mxu1 %v3438_v5 }
 0x345   :  { %1567 = vmatprep.subr.bf16.mxu0 %v3497_v37  ;;  %2700 = vmatprep.subr.bf16.mxu1 %v4282_v30 }
 0x348   :  { %1568 = vmatpush1.bf16.msra.mxu0 %v3506_v47  ;;  %2701 = vmatpush3.bf16.msra.mxu1 %v3462_v15 }
 0x349   :  { %1569 = vmatprep.subr.bf16.mxu0 %v3512_v51  ;;  %2702 = vmatprep.subr.bf16.mxu1 %v4282_v30 }
 0x34c   :  { %1570 = vmatpush1.bf16.msra.mxu0 %v3520_v60  ;;  %2703 = vmatpush3.bf16.msra.mxu1 %v3482_v28 }
 0x34d   :  { %1690 = vmatprep.subr.bf16.mxu0 %v3832_v17  ;;  %2708 = vmatprep.subr.bf16.mxu1 %v4282_v30 }
 0x3ef   :  { %v1454_v25 = vpop.f32.mrf.mxu0  ;;  %v1497_v33 = vpop.f32.mrf.mxu1 }
 0x3f0   :  { %v1504_v39 = vadd.f32 %v1454_v25, %v3611_v9 }
 0x3f1   :  { %v1456_v42 = vpop.f32.mrf.mxu0  ;;  %v2686_v44 = vpop.f32.mrf.mxu1 }
 0x3f2   :  { %v2417_v49 = vmul.f32 -1.442695, %v1504_v39  ;;  %v1505_v63 = vadd.f32 %v1456_v42, %v3614_v24  ;;  %v1532_v24 = vadd.f32 %v3731_v41, %v1497_v33  ;;  %v3855_v42 = vld [vmem:[%s4244_s5 + $0xa8] ss:$12 sps:$4 sm:$0xff]   ;;  %v3877_v44 = vld [vmem:[%s4244_s5 + $0x90] ss:$12 sps:$4 sm:$0xff]  }
 0x3f3   :  { %v1458_v52 = vpop.f32.mrf.mxu0  ;;  %v1500_v54 = vpop.f32.mrf.mxu1 }
 0x3f4   :  { %2970 = vpow2.f32 %v2417_v49  ;;  %v1506_v5 = vadd.f32 %v1458_v52, %v3617_v29  ;;  %v2418_v16 = vmul.f32 -1.442695, %v1505_v63  ;;  %v1533_v23 = vadd.f32 %v3731_v41, %v1500_v54  ;;  %v3883_v49 = vld [vmem:[%s4244_s5 + $0x98] ss:$12 sps:$4 sm:$0xff]   ;;  %v3889_v52 = vld [vmem:[%s4244_s5 + $0x7c] ss:$12 sps:$4 sm:$0xff]  }
 0x3f5   :  { %v2687_v7 = vpop.f32.mrf.mxu1  ;;  %v1460_v14 = vpop.f32.mrf.mxu0  ;;  %v3897_v54 = vld [vmem:[%s4244_s5 + $0x80] ss:$12 sps:$4 sm:$0xff]  }
 0x3f6   :  { %v2419_v56 = vmul.f32 -1.442695, %v1506_v5  ;;  %v1507_v2 = vadd.f32 %v1460_v14, %v3622_v35  ;;  %v3906_v5 = vld [vmem:[%s4244_s5 + $0x68] ss:$12 sps:$4 sm:$0xff]  }
 0x3f8   :  { %2972 = vpow2.f32 %v2419_v56  ;;  %v2420_v55 = vmul.f32 -1.442695, %v1507_v2  ;;  %v4284_v56 = vld [vmem:[#allocation5_spill] sm:$0xff] }
 0x3f9   :  { %2974 = vpow2.f32 %v2418_v16 }
 0x3fa   :  { %2976 = vpow2.f32 %v2420_v55 }
 0x401   :  { %v2971_v9 = vpop.eup %2970 }
 0x402   :  { %v1520_v11 = vadd.f32 1.0, %v2971_v9 }
 0x404   :  { %2978 = vrcp.f32 %v1520_v11 }
 0x405   :  { %v2973_v32 = vpop.eup %2972 }
 0x406   :  { %v1522_v12 = vadd.f32 1.0, %v2973_v32  ;;  %v2975_v40 = vpop.eup %2974 }
 0x407   :  { %v2977_v29 = vpop.eup %2976  ;;  %v1521_v20 = vadd.f32 1.0, %v2975_v40 }
 0x408   :  { %2980 = vrcp.f32 %v1522_v12  ;;  %v1523_v61 = vadd.f32 1.0, %v2977_v29 }
 0x409   :  { %2982 = vrcp.f32 %v1521_v20 }
 0x40a   :  { %2984 = vrcp.f32 %v1523_v61 }
 0x411   :  { %v2979_v53 = vpop.eup %2978 }
 0x412   :  { %v1534_v1 = vmul.f32 %v2979_v53, %v1532_v24  ;;  %v4285_v24 = vld [vmem:[#allocation3_spill] sm:$0xff] }
 0x414   :  { %v1536_v35 = vadd.f32 %v1534_v1, %v3634_v50 }
 0x415   :  { %v2981_v58 = vpop.eup %2980 }
 0x416   :  { %2986 = vtanh.f32 %v1536_v35  ;;  %v1535_v46 = vmul.f32 %v2981_v58, %v1533_v23  ;;  %v2983_v36 = vpop.eup %2982  ;;  %v4286_v23 = vld [vmem:[#allocation4_spill] sm:$0xff] }
 0x417   :  { %v2985_v31 = vpop.eup %2984  ;;  %v1540_v57 = vsub.f32 1.0, %v2983_v36  ;;  %v1544_v4 = vmul.f32 %v2983_v36, %v3789_v8  ;;  %v3861_v8 = vld [vmem:[%s4244_s5 + $0xb0] ss:$12 sps:$4 sm:$0xff]  }
 0x418   :  { %v1537_v59 = vadd.f32 %v1535_v46, %v3646_v21  ;;  %v1541_v45 = vsub.f32 1.0, %v2985_v31  ;;  %v1545_v33 = vmul.f32 %v2985_v31, %v3792_v27  ;;  %v3867_v27 = vld [vmem:[%s4244_s5 + $0x94] ss:$12 sps:$4 sm:$0xff]  }
 0x41a   :  { %2988 = vtanh.f32 %v1537_v59 }
 0x423   :  { %v2987_v43 = vpop.eup %2986 }
 0x424   :  { %v1542_v6 = vmul.f32 %v2987_v43, %v1540_v57 }
 0x426   :  { %v3845_v18 = vadd.f32 %v1544_v4, %v1542_v6 }
 0x427   :  { %v2989_v50 = vpop.eup %2988 }
 0x428   :  { %v1543_v25 = vmul.f32 %v2989_v50, %v1541_v45 }
 0x42a   :  { %v3848_v39 = vadd.f32 %v1545_v33, %v1543_v25 }
 0x42c   :  { %v1554_v21 = vpack.c.bf16 %v3848_v39, %v3845_v18 }
 0x42e   :  { %1588 = vmatmul.mubr.bf16.vlgmr.msra.gmra.mxu0 %v1554_v21  ;;  %2705 = vmatmul.mubr.bf16.vlgmr.msra.gmra.mxu1 %v1554_v21 }
 0x42f   :  { %1691 = vmatpush1.bf16.msra.mxu0 %v3855_v42  ;;  %2709 = vmatpush3.bf16.msra.mxu1 %v3861_v8 }
 0x430   :  { %1692 = vmatprep.subr.bf16.mxu0 %v3867_v27  ;;  %2710 = vmatprep.subr.bf16.mxu1 %v4282_v30 }
 0x431   :  { %1722 = vmatprep.mubr.bf16.mxu0 %v4283_v19  ;;  %2724 = vmatprep.mubr.msk.bf16.mxu1 %vm3117_vm0, %v4282_v30 }
 0x433   :  { %1693 = vmatpush1.bf16.msra.mxu0 %v3877_v44  ;;  %2711 = vmatpush3.bf16.msra.mxu1 %v3883_v49 }
 0x434   :  { %1694 = vmatprep.subr.bf16.mxu0 %v3889_v52  ;;  %2712 = vmatprep.subr.bf16.mxu1 %v4282_v30 }
 0x437   :  { %1695 = vmatpush1.bf16.msra.mxu0 %v3426_v62  ;;  %2713 = vmatpush3.bf16.msra.mxu1 %v3897_v54  ;;  %v3915_v62 = vld [vmem:[%s4244_s5 + $0x50] ss:$12 sps:$4 sm:$0xff]  }
 0x438   :  { %1696 = vmatprep.subr.bf16.mxu0 %v3432_v3  ;;  %2714 = vmatprep.subr.bf16.mxu1 %v4282_v30  ;;  %v3924_v3 = vld [vmem:[%s4244_s5 + $0x38] ss:$12 sps:$4 sm:$0xff]  }
 0x43b   :  { %1697 = vmatpush1.bf16.msra.mxu0 %v3448_v10  ;;  %2715 = vmatpush3.bf16.msra.mxu1 %v3906_v5 }
 0x43c   :  { %1698 = vmatprep.subr.bf16.mxu0 %v3455_v13  ;;  %2716 = vmatprep.subr.bf16.mxu1 %v4282_v30 }
 0x43f   :  { %1699 = vmatpush1.bf16.msra.mxu0 %v3470_v22  ;;  %2717 = vmatpush3.bf16.msra.mxu1 %v3915_v62 }
 0x440   :  { %1700 = vmatprep.subr.bf16.mxu0 %v3476_v26  ;;  %2718 = vmatprep.subr.bf16.mxu1 %v4282_v30 }
 0x443   :  { %1701 = vmatpush1.bf16.msra.mxu0 %v3490_v34  ;;  %2719 = vmatpush3.bf16.msra.mxu1 %v3924_v3 }
 0x444   :  { %1702 = vmatprep.subr.bf16.mxu0 %v3497_v37  ;;  %2720 = vmatprep.subr.bf16.mxu1 %v4282_v30 }
 0x447   :  { %1703 = vmatpush1.bf16.msra.mxu0 %v3506_v47  ;;  %2721 = vmatpush3.bf16.msra.mxu1 %v3462_v15 }
 0x448   :  { %1704 = vmatprep.subr.bf16.mxu0 %v3512_v51  ;;  %2722 = vmatprep.subr.bf16.mxu1 %v4282_v30 }
 0x44b   :  { %1705 = vmatpush1.bf16.msra.mxu0 %v3520_v60  ;;  %2723 = vmatpush3.bf16.msra.mxu1 %v3482_v28 }
 0x44c   :  { %1825 = vmatprep.subr.bf16.mxu0 %v3832_v17  ;;  %2728 = vmatprep.subr.bf16.mxu1 %v4282_v30 }
 0x4ee   :  { %v1589_v10 = vpop.f32.mrf.mxu0  ;;  %v1632_v13 = vpop.f32.mrf.mxu1 }
 0x4ef   :  { %v1639_v22 = vadd.f32 %v1589_v10, %v3625_v38  ;;  %v3981_v10 = vld [vmem:[%s4244_s5 + $0x60] ss:$12 sps:$4 sm:$0xff]  }
 0x4f0   :  { %v1591_v26 = vpop.f32.mrf.mxu0  ;;  %v2706_v34 = vpop.f32.mrf.mxu1 }
 0x4f1   :  { %v2421_v37 = vmul.f32 -1.442695, %v1639_v22  ;;  %v1640_v60 = vadd.f32 %v1591_v26, %v3631_v48  ;;  %v1667_v48 = vadd.f32 %v3731_v41, %v1632_v13  ;;  %v3988_v13 = vld [vmem:[%s4244_s5 + $0x4c] ss:$12 sps:$4 sm:$0xff]   ;;  %v3995_v22 = vld [vmem:[%s4244_s5 + $0x48] ss:$12 sps:$4 sm:$0xff]  }
 0x4f2   :  { %v1593_v15 = vpop.f32.mrf.mxu0  ;;  %v1635_v47 = vpop.f32.mrf.mxu1  ;;  %v4002_v26 = vld [vmem:[%s4244_s5 + $0x34] ss:$12 sps:$4 sm:$0xff]   ;;  %v4009_v34 = vld [vmem:[%s4244_s5 + $0x30] ss:$12 sps:$4 sm:$0xff]  }
 0x4f3   :  { %2990 = vpow2.f32 %v2421_v37  ;;  %v1641_v51 = vadd.f32 %v1593_v15, %v3637_v0  ;;  %v2422_v2 = vmul.f32 -1.442695, %v1640_v60  ;;  %v1668_v61 = vadd.f32 %v3731_v41, %v1635_v47  ;;  %v4016_v37 = vld [vmem:[%s4244_s5 + $0x1c] ss:$12 sps:$4 sm:$0xff]   ;;  %v4023_v15 = vld [vmem:[%s4244_s5 + $0x18] ss:$12 sps:$4 sm:$0xff]  }
 0x4f4   :  { %v2707_v7 = vpop.f32.mrf.mxu1  ;;  %v1595_v63 = vpop.f32.mrf.mxu0  ;;  %v4029_v47 = vld [vmem:[%s4244_s5 + $0x20] ss:$12 sps:$4 sm:$0xff]   ;;  %v4048_v60 = vld [vmem:[%s4244_s5 + $0x8] ss:$12 sps:$4 sm:$0xff]  }
 0x4f5   :  { %v2423_v28 = vmul.f32 -1.442695, %v1641_v51  ;;  %v1642_v14 = vadd.f32 %v1595_v63, %v4284_v56  ;;  %v4035_v51 = vld [vmem:[%s4244_s5 + $0x4] ss:$12 sps:$4 sm:$0xff]   ;;  %v4042_v7 = vld [vmem:[%s4244_s5] ss:$12 sps:$4 sm:$0xff]  }
 0x4f6   :  { %v4287_v56 = vld [vmem:[#allocation6_spill] sm:$0xff] }
 0x4f7   :  { %2992 = vpow2.f32 %v2423_v28  ;;  %v2424_v16 = vmul.f32 -1.442695, %v1642_v14 }
 0x4f8   :  { %2994 = vpow2.f32 %v2422_v2 }
 0x4f9   :  { %2996 = vpow2.f32 %v2424_v16 }
 0x500   :  { %v2991_v38 = vpop.eup %2990 }
 0x501   :  { %v1655_v55 = vadd.f32 1.0, %v2991_v38 }
 0x503   :  { %2998 = vrcp.f32 %v1655_v55 }
 0x504   :  { %v2993_v9 = vpop.eup %2992 }
 0x505   :  { %v1657_v11 = vadd.f32 1.0, %v2993_v9  ;;  %v2995_v32 = vpop.eup %2994 }
 0x506   :  { %v2997_v0 = vpop.eup %2996  ;;  %v1656_v12 = vadd.f32 1.0, %v2995_v32 }
 0x507   :  { %3000 = vrcp.f32 %v1657_v11  ;;  %v1658_v29 = vadd.f32 1.0, %v2997_v0  ;;  %v4288_v11 = vld [vmem:[#allocation8_spill] sm:$0xff] }
 0x508   :  { %3002 = vrcp.f32 %v1656_v12  ;;  %v4289_v12 = vld [vmem:[#allocation7_spill] sm:$0xff] }
 0x509   :  { %3004 = vrcp.f32 %v1658_v29 }
 0x510   :  { %v2999_v40 = vpop.eup %2998 }
 0x511   :  { %v1669_v20 = vmul.f32 %v2999_v40, %v1667_v48 }
 0x513   :  { %v1671_v53 = vadd.f32 %v1669_v20, %v4285_v24  ;;  %v4290_v20 = vld [vmem:[#allocation9_spill] sm:$0xff] }
 0x514   :  { %v3001_v1 = vpop.eup %3000 }
 0x515   :  { %3006 = vtanh.f32 %v1671_v53  ;;  %v1670_v35 = vmul.f32 %v3001_v1, %v1668_v61  ;;  %v3003_v46 = vpop.eup %3002 }
 0x516   :  { %v3005_v59 = vpop.eup %3004  ;;  %v1675_v36 = vsub.f32 1.0, %v3003_v46  ;;  %v1679_v43 = vmul.f32 %v3003_v46, %v3845_v18  ;;  %v3967_v18 = vld [vmem:[%s4244_s5 + $0x78] ss:$12 sps:$4 sm:$0xff]  }
 0x517   :  { %v1672_v58 = vadd.f32 %v1670_v35, %v4286_v23  ;;  %v1676_v6 = vsub.f32 1.0, %v3005_v59  ;;  %v1680_v25 = vmul.f32 %v3005_v59, %v3848_v39  ;;  %v3974_v39 = vld [vmem:[%s4244_s5 + $0x64] ss:$12 sps:$4 sm:$0xff]  }
 0x519   :  { %3008 = vtanh.f32 %v1672_v58 }
 0x522   :  { %v3007_v31 = vpop.eup %3006 }
 0x523   :  { %v1677_v57 = vmul.f32 %v3007_v31, %v1675_v36 }
 0x525   :  { %v3946_v4 = vadd.f32 %v1679_v43, %v1677_v57 }
 0x526   :  { %v3009_v45 = vpop.eup %3008 }
 0x527   :  { %v1678_v50 = vmul.f32 %v3009_v45, %v1676_v6  ;;  %v4291_v45 = vld [vmem:[#allocation13_spill] sm:$0xff] }
 0x529   :  { %v3949_v33 = vadd.f32 %v1680_v25, %v1678_v50 }
 0x52b   :  { %v1689_v21 = vpack.c.bf16 %v3949_v33, %v3946_v4 }
 0x52d   :  { %1723 = vmatmul.mubr.bf16.vlgmr.msra.gmra.mxu0 %v1689_v21  ;;  %2725 = vmatmul.mubr.bf16.vlgmr.msra.gmra.mxu1 %v1689_v21 }
 0x52e   :  { %1826 = vmatpush1.bf16.msra.mxu0 %v3855_v42  ;;  %2729 = vmatpush3.bf16.msra.mxu1 %v3861_v8 }
 0x52f   :  { %1827 = vmatprep.subr.bf16.mxu0 %v3867_v27  ;;  %2730 = vmatprep.subr.bf16.mxu1 %v4282_v30 }
 0x530   :  { %1857 = vmatprep.mubr.bf16.mxu0 %v4283_v19  ;;  %2744 = vmatprep.mubr.msk.bf16.mxu1 %vm3117_vm0, %v4282_v30 }
 0x532   :  { %1828 = vmatpush1.bf16.msra.mxu0 %v3877_v44  ;;  %2731 = vmatpush3.bf16.msra.mxu1 %v3883_v49 }
 0x533   :  { %1829 = vmatprep.subr.bf16.mxu0 %v3889_v52  ;;  %2732 = vmatprep.subr.bf16.mxu1 %v4282_v30 }
 0x536   :  { %1830 = vmatpush1.bf16.msra.mxu0 %v3967_v18  ;;  %2733 = vmatpush3.bf16.msra.mxu1 %v3897_v54 }
 0x537   :  { %1831 = vmatprep.subr.bf16.mxu0 %v3974_v39  ;;  %2734 = vmatprep.subr.bf16.mxu1 %v4282_v30 }
 0x53a   :  { %1832 = vmatpush1.bf16.msra.mxu0 %v3981_v10  ;;  %2735 = vmatpush3.bf16.msra.mxu1 %v3906_v5 }
 0x53b   :  { %1833 = vmatprep.subr.bf16.mxu0 %v3988_v13  ;;  %2736 = vmatprep.subr.bf16.mxu1 %v4282_v30 }
 0x53e   :  { %1834 = vmatpush1.bf16.msra.mxu0 %v3995_v22  ;;  %2737 = vmatpush3.bf16.msra.mxu1 %v3915_v62 }
 0x53f   :  { %1835 = vmatprep.subr.bf16.mxu0 %v4002_v26  ;;  %2738 = vmatprep.subr.bf16.mxu1 %v4282_v30 }
 0x542   :  { %1836 = vmatpush1.bf16.msra.mxu0 %v4009_v34  ;;  %2739 = vmatpush3.bf16.msra.mxu1 %v3924_v3 }
 0x543   :  { %1837 = vmatprep.subr.bf16.mxu0 %v4016_v37  ;;  %2740 = vmatprep.subr.bf16.mxu1 %v4282_v30 }
 0x546   :  { %1838 = vmatpush1.bf16.msra.mxu0 %v4023_v15  ;;  %2741 = vmatpush3.bf16.msra.mxu1 %v4029_v47 }
 0x547   :  { %1839 = vmatprep.subr.bf16.mxu0 %v4035_v51  ;;  %2742 = vmatprep.subr.bf16.mxu1 %v4282_v30 }
 0x54a   :  { %1840 = vmatpush1.bf16.msra.mxu0 %v4042_v7  ;;  %2743 = vmatpush3.bf16.msra.mxu1 %v4048_v60 }
 0x54b   :  { %1960 = vmatprep.subr.bf16.mxu0 %v3832_v17  ;;  %2748 = vmatprep.subr.bf16.mxu1 %v4282_v30 }
 0x5ed   :  { %v1724_v28 = vpop.f32.mrf.mxu0  ;;  %v1767_v63 = vpop.f32.mrf.mxu1 }
 0x5ee   :  { %v1774_v14 = vadd.f32 %v1724_v28, %v4287_v56  ;;  %v1802_v31 = vadd.f32 %v3731_v41, %v1767_v63  ;;  %v4292_v56 = vld [vmem:[#allocation17_spill] sm:$0xff] }
 0x5ef   :  { %v1726_v2 = vpop.f32.mrf.mxu0  ;;  %v2726_v16 = vpop.f32.mrf.mxu1 }
 0x5f0   :  { %v2425_v38 = vmul.f32 -1.442695, %v1774_v14  ;;  %v1775_v48 = vadd.f32 %v1726_v2, %v4289_v12 }
 0x5f1   :  { %v1728_v55 = vpop.f32.mrf.mxu0  ;;  %v1770_v9 = vpop.f32.mrf.mxu1 }
 0x5f2   :  { %3010 = vpow2.f32 %v2425_v38  ;;  %v1776_v32 = vadd.f32 %v1728_v55, %v4288_v11  ;;  %v2426_v53 = vmul.f32 -1.442695, %v1775_v48  ;;  %v1803_v25 = vadd.f32 %v3731_v41, %v1770_v9 }
 0x5f3   :  { %v2727_v0 = vpop.f32.mrf.mxu1  ;;  %v1730_v29 = vpop.f32.mrf.mxu0 }
 0x5f4   :  { %v2427_v40 = vmul.f32 -1.442695, %v1776_v32  ;;  %v1777_v24 = vadd.f32 %v1730_v29, %v4290_v20  ;;  %v4293_v20 = vld [vmem:[#allocation10_spill] sm:$0xff] }
 0x5f6   :  { %3012 = vpow2.f32 %v2427_v40  ;;  %v2428_v61 = vmul.f32 -1.442695, %v1777_v24 }
 0x5f7   :  { %3014 = vpow2.f32 %v2426_v53 }
 0x5f8   :  { %3016 = vpow2.f32 %v2428_v61 }
 0x5ff   :  { %v3011_v1 = vpop.eup %3010 }
 0x600   :  { %v1790_v35 = vadd.f32 1.0, %v3011_v1 }
 0x602   :  { %3018 = vrcp.f32 %v1790_v35 }
 0x603   :  { %v3013_v23 = vpop.eup %3012 }
 0x604   :  { %v1792_v58 = vadd.f32 1.0, %v3013_v23  ;;  %v3015_v46 = vpop.eup %3014 }
 0x605   :  { %v3017_v59 = vpop.eup %3016  ;;  %v1791_v36 = vadd.f32 1.0, %v3015_v46 }
 0x606   :  { %3020 = vrcp.f32 %v1792_v58  ;;  %v1793_v43 = vadd.f32 1.0, %v3017_v59  ;;  %v4294_v58 = vld [vmem:[#allocation14_spill] sm:$0xff] }
 0x607   :  { %3022 = vrcp.f32 %v1791_v36  ;;  %v4295_v36 = vld [vmem:[#allocation12_spill] sm:$0xff] }
 0x608   :  { %3024 = vrcp.f32 %v1793_v43 }
 0x60f   :  { %v3019_v57 = vpop.eup %3018 }
 0x610   :  { %v1804_v6 = vmul.f32 %v3019_v57, %v1802_v31 }
 0x612   :  { %v1806_v50 = vadd.f32 %v1804_v6, %v4291_v45 }
 0x613   :  { %v3021_v21 = vpop.eup %3020 }
 0x614   :  { %3026 = vtanh.f32 %v1806_v50  ;;  %v1805_v28 = vmul.f32 %v3021_v21, %v1803_v25  ;;  %v3023_v2 = vpop.eup %3022 }
 0x615   :  { %v3025_v16 = vpop.eup %3024  ;;  %v1810_v38 = vsub.f32 1.0, %v3023_v2  ;;  %v1814_v11 = vmul.f32 %v3023_v2, %v3946_v4 }
 0x616   :  { %v1807_v14 = vadd.f32 %v1805_v28, %v4292_v56  ;;  %v1811_v32 = vsub.f32 1.0, %v3025_v16  ;;  %v1815_v9 = vmul.f32 %v3025_v16, %v3949_v33 }
 0x618   :  { %3028 = vtanh.f32 %v1807_v14 }
 0x621   :  { %v3027_v55 = vpop.eup %3026 }
 0x622   :  { %v1812_v63 = vmul.f32 %v3027_v55, %v1810_v38 }
 0x624   :  { %v4062_v0 = vadd.f32 %v1814_v11, %v1812_v63 }
 0x625   :  { %v3029_v12 = vpop.eup %3028 }
 0x626   :  { %v1813_v48 = vmul.f32 %v3029_v12, %v1811_v32  ;;  %v4297_v32 = vld [vmem:[#allocation11_spill] sm:$0xff] }
 0x628   :  { %v4065_v40 = vadd.f32 %v1815_v9, %v1813_v48 }
 0x62a   :  { %v1824_v29 = vpack.c.bf16 %v4065_v40, %v4062_v0 }
 0x62c   :  { %1858 = vmatmul.mubr.bf16.vlgmr.msra.gmra.mxu0 %v1824_v29  ;;  %2745 = vmatmul.mubr.bf16.vlgmr.msra.gmra.mxu1 %v1824_v29 }
 0x62d   :  { %1961 = vmatpush1.bf16.msra.mxu0 %v3855_v42  ;;  %2749 = vmatpush3.bf16.msra.mxu1 %v3861_v8 }
 0x62e   :  { %1962 = vmatprep.subr.bf16.mxu0 %v3867_v27  ;;  %2750 = vmatprep.subr.bf16.mxu1 %v4282_v30 }
 0x62f   :  { %1992 = vmatprep.mubr.bf16.mxu0 %v4283_v19  ;;  %2764 = vmatprep.mubr.msk.bf16.mxu1 %vm3117_vm0, %v4282_v30 }
 0x631   :  { %1963 = vmatpush1.bf16.msra.mxu0 %v3877_v44  ;;  %2751 = vmatpush3.bf16.msra.mxu1 %v3883_v49 }
 0x632   :  { %1964 = vmatprep.subr.bf16.mxu0 %v3889_v52  ;;  %2752 = vmatprep.subr.bf16.mxu1 %v4282_v30 }
 0x635   :  { %1965 = vmatpush1.bf16.msra.mxu0 %v3967_v18  ;;  %2753 = vmatpush3.bf16.msra.mxu1 %v3897_v54 }
 0x636   :  { %1966 = vmatprep.subr.bf16.mxu0 %v3974_v39  ;;  %2754 = vmatprep.subr.bf16.mxu1 %v4282_v30 }
 0x639   :  { %1967 = vmatpush1.bf16.msra.mxu0 %v3981_v10  ;;  %2755 = vmatpush3.bf16.msra.mxu1 %v3906_v5 }
 0x63a   :  { %1968 = vmatprep.subr.bf16.mxu0 %v3988_v13  ;;  %2756 = vmatprep.subr.bf16.mxu1 %v4282_v30 }
 0x63d   :  { %1969 = vmatpush1.bf16.msra.mxu0 %v3995_v22  ;;  %2757 = vmatpush3.bf16.msra.mxu1 %v3915_v62 }
 0x63e   :  { %1970 = vmatprep.subr.bf16.mxu0 %v4002_v26  ;;  %2758 = vmatprep.subr.bf16.mxu1 %v4282_v30 }
 0x641   :  { %1971 = vmatpush1.bf16.msra.mxu0 %v4009_v34  ;;  %2759 = vmatpush3.bf16.msra.mxu1 %v3924_v3 }
 0x642   :  { %1972 = vmatprep.subr.bf16.mxu0 %v4016_v37  ;;  %2760 = vmatprep.subr.bf16.mxu1 %v4282_v30 }
 0x645   :  { %1973 = vmatpush1.bf16.msra.mxu0 %v4023_v15  ;;  %2761 = vmatpush3.bf16.msra.mxu1 %v4029_v47 }
 0x646   :  { %1974 = vmatprep.subr.bf16.mxu0 %v4035_v51  ;;  %2762 = vmatprep.subr.bf16.mxu1 %v4282_v30 }
 0x649   :  { %1975 = vmatpush1.bf16.msra.mxu0 %v4042_v7  ;;  %2763 = vmatpush3.bf16.msra.mxu1 %v4048_v60 }
 0x64a   :  { %2095 = vmatprep.subr.bf16.mxu0 %v3832_v17  ;;  %2768 = vmatprep.subr.bf16.mxu1 %v4282_v30  ;;  %v4296_v17 = vld [vmem:[#allocation16_spill] sm:$0xff] }
 0x6ec   :  { %v1859_v4 = vpop.f32.mrf.mxu0  ;;  %v1902_v33 = vpop.f32.mrf.mxu1 }
 0x6ed   :  { %v1909_v24 = vadd.f32 %v1859_v4, %v4293_v20  ;;  %v1937_v38 = vadd.f32 %v3731_v41, %v1902_v33  ;;  %v4298_v4 = vld [vmem:[#allocation15_spill] sm:$0xff] }
 0x6ee   :  { %v1861_v53 = vpop.f32.mrf.mxu0  ;;  %v2746_v61 = vpop.f32.mrf.mxu1 }
 0x6ef   :  { %v2429_v1 = vmul.f32 -1.442695, %v1909_v24  ;;  %v1910_v31 = vadd.f32 %v1861_v53, %v4295_v36 }
 0x6f0   :  { %v1863_v35 = vpop.f32.mrf.mxu0  ;;  %v1905_v23 = vpop.f32.mrf.mxu1 }
 0x6f1   :  { %3030 = vpow2.f32 %v2429_v1  ;;  %v1911_v46 = vadd.f32 %v1863_v35, %v4294_v58  ;;  %v2430_v45 = vmul.f32 -1.442695, %v1910_v31  ;;  %v1938_v48 = vadd.f32 %v3731_v41, %v1905_v23 }
 0x6f2   :  { %v2747_v59 = vpop.f32.mrf.mxu1  ;;  %v1865_v43 = vpop.f32.mrf.mxu0 }
 0x6f3   :  { %v2431_v57 = vmul.f32 -1.442695, %v1911_v46  ;;  %v1912_v6 = vadd.f32 %v1865_v43, %v4296_v17 }
 0x6f5   :  { %3032 = vpow2.f32 %v2431_v57  ;;  %v2432_v50 = vmul.f32 -1.442695, %v1912_v6  ;;  %v4160_v57 = vld [vmem:[%s4247_s6] ss:$0 sm:$0xff] }
 0x6f6   :  { %3034 = vpow2.f32 %v2430_v45 }
 0x6f7   :  { %3036 = vpow2.f32 %v2432_v50  ;;  %v4303_v50 = vld [vmem:[#allocation24_spill] sm:$0xff] }
 0x6fe   :  { %v3031_v25 = vpop.eup %3030 }
 0x6ff   :  { %v1925_v21 = vadd.f32 1.0, %v3031_v25 }
 0x701   :  { %3038 = vrcp.f32 %v1925_v21 }
 0x702   :  { %v3033_v28 = vpop.eup %3032 }
 0x703   :  { %v1927_v56 = vadd.f32 1.0, %v3033_v28  ;;  %v3035_v14 = vpop.eup %3034 }
 0x704   :  { %v3037_v2 = vpop.eup %3036  ;;  %v1926_v16 = vadd.f32 1.0, %v3035_v14  ;;  %v4304_v14 = vld [vmem:[#allocation28_spill] sm:$0xff] }
 0x705   :  { %3040 = vrcp.f32 %v1927_v56  ;;  %v1928_v63 = vadd.f32 1.0, %v3037_v2 }
 0x706   :  { %3042 = vrcp.f32 %v1926_v16 }
 0x707   :  { %3044 = vrcp.f32 %v1928_v63 }
 0x70e   :  { %v3039_v55 = vpop.eup %3038 }
 0x70f   :  { %v1939_v11 = vmul.f32 %v3039_v55, %v1937_v38 }
 0x711   :  { %v1941_v12 = vadd.f32 %v1939_v11, %v4297_v32 }
 0x712   :  { %v3041_v9 = vpop.eup %3040 }
 0x713   :  { %3046 = vtanh.f32 %v1941_v12  ;;  %v1940_v29 = vmul.f32 %v3041_v9, %v1938_v48  ;;  %v3043_v24 = vpop.eup %3042 }
 0x714   :  { %v3045_v53 = vpop.eup %3044  ;;  %v1945_v61 = vsub.f32 1.0, %v3043_v24  ;;  %v1949_v35 = vmul.f32 %v3043_v24, %v4062_v0 }
 0x715   :  { %v1942_v20 = vadd.f32 %v1940_v29, %v4298_v4  ;;  %v1946_v58 = vsub.f32 1.0, %v3045_v53  ;;  %v1950_v41 = vmul.f32 %v3045_v53, %v4065_v40  ;;  %v2238_v53 = vld [vmem:[%s4248_s7 + $0x78] sm:$0xff] }
 0x717   :  { %3048 = vtanh.f32 %v1942_v20 }
 0x720   :  { %v3047_v1 = vpop.eup %3046 }
 0x721   :  { %v1947_v33 = vmul.f32 %v3047_v1, %v1945_v61  ;;  %v2237_v61 = vld [vmem:[%s4248_s7 + $0x70] sm:$0xff]  ;;  %v2236_v1 = vld [vmem:[%s4248_s7 + $0x68] sm:$0xff] }
 0x723   :  { %v4113_v46 = vadd.f32 %v1949_v35, %v1947_v33  ;;  %v2235_v33 = vld [vmem:[%s4248_s7 + $0x60] sm:$0xff]  ;;  %v2234_v35 = vld [vmem:[%s4248_s7 + $0x58] sm:$0xff] }
 0x724   :  { %v3049_v59 = vpop.eup %3048 }
 0x725   :  { %v1948_v36 = vmul.f32 %v3049_v59, %v1946_v58  ;;  %v2233_v58 = vld [vmem:[%s4248_s7 + $0x50] sm:$0xff]  ;;  %v2231_v59 = vld [vmem:[%s4248_s7 + $0x40] sm:$0xff] }
 0x727   :  { %v4116_v23 = vadd.f32 %v1950_v41, %v1948_v36  ;;  %v2230_v36 = vld [vmem:[%s4248_s7 + $0x38] sm:$0xff]  ;;  %v2229_v41 = vld [vmem:[%s4248_s7 + $0x30] sm:$0xff] }
 0x729   :  { %v1959_v31 = vpack.c.bf16 %v4116_v23, %v4113_v46 }
 0x72b   :  { %1993 = vmatmul.mubr.bf16.vlgmr.msra.gmra.mxu0 %v1959_v31  ;;  %2765 = vmatmul.mubr.bf16.vlgmr.msra.gmra.mxu1 %v1959_v31  ;;  %v2227_v31 = vld [vmem:[%s4248_s7 + $0x20] sm:$0xff] }
 0x72c   :  { %2096 = vmatpush1.bf16.msra.mxu0 %v3855_v42  ;;  %2769 = vmatpush3.bf16.msra.mxu1 %v3861_v8  ;;  %v4299_v8 = vld [vmem:[#allocation18_spill] sm:$0xff] }
 0x72d   :  { %2097 = vmatprep.subr.bf16.mxu0 %v3867_v27  ;;  %2770 = vmatprep.subr.bf16.mxu1 %v4282_v30 }
 0x72e   :  { %2127 = vmatprep.mubr.bf16.mxu0 %v4283_v19  ;;  %2784 = vmatprep.mubr.msk.bf16.mxu1 %vm3117_vm0, %v4282_v30 }
 0x730   :  { %2098 = vmatpush1.bf16.msra.mxu0 %v3877_v44  ;;  %2771 = vmatpush3.bf16.msra.mxu1 %v3883_v49 }
 0x731   :  { %2099 = vmatprep.subr.bf16.mxu0 %v3889_v52  ;;  %2772 = vmatprep.subr.bf16.mxu1 %v4282_v30 }
 0x734   :  { %2100 = vmatpush1.bf16.msra.mxu0 %v3967_v18  ;;  %2773 = vmatpush3.bf16.msra.mxu1 %v3897_v54 }
 0x735   :  { %2101 = vmatprep.subr.bf16.mxu0 %v3974_v39  ;;  %2774 = vmatprep.subr.bf16.mxu1 %v4282_v30  ;;  %v4301_v39 = vld [vmem:[#allocation19_spill] sm:$0xff] }
 0x738   :  { %2102 = vmatpush1.bf16.msra.mxu0 %v3981_v10  ;;  %2775 = vmatpush3.bf16.msra.mxu1 %v3906_v5 }
 0x739   :  { %2103 = vmatprep.subr.bf16.mxu0 %v3988_v13  ;;  %2776 = vmatprep.subr.bf16.mxu1 %v4282_v30 }
 0x73c   :  { %2104 = vmatpush1.bf16.msra.mxu0 %v3995_v22  ;;  %2777 = vmatpush3.bf16.msra.mxu1 %v3915_v62  ;;  %v4300_v62 = vld [vmem:[#allocation20_spill] sm:$0xff]  ;;  %v4302_v22 = vld [vmem:[#allocation21_spill] sm:$0xff] }
 0x73d   :  { %2105 = vmatprep.subr.bf16.mxu0 %v4002_v26  ;;  %2778 = vmatprep.subr.bf16.mxu1 %v4282_v30 }
 0x740   :  { %2106 = vmatpush1.bf16.msra.mxu0 %v4009_v34  ;;  %2779 = vmatpush3.bf16.msra.mxu1 %v3924_v3 }
 0x741   :  { %2107 = vmatprep.subr.bf16.mxu0 %v4016_v37  ;;  %2780 = vmatprep.subr.bf16.mxu1 %v4282_v30 }
 0x744   :  { %2108 = vmatpush1.bf16.msra.mxu0 %v4023_v15  ;;  %2781 = vmatpush3.bf16.msra.mxu1 %v4029_v47 }
 0x745   :  { %2109 = vmatprep.subr.bf16.mxu0 %v4035_v51  ;;  %2782 = vmatprep.subr.bf16.mxu1 %v4282_v30 }
 0x748   :  { %2110 = vmatpush1.bf16.msra.mxu0 %v4042_v7  ;;  %2783 = vmatpush3.bf16.msra.mxu1 %v4048_v60 }
 0x749   :  { %2788 = vmatprep.subr.mxu0 %v2238_v53 }
 0x7eb   :  { %v1994_v19 = vpop.f32.mrf.mxu0  ;;  %v2037_v42 = vpop.f32.mrf.mxu1 }
 0x7ec   :  { %v2044_v27 = vadd.f32 %v1994_v19, %v4299_v8  ;;  %v2072_v43 = vadd.f32 %v4160_v57, %v2037_v42  ;;  %v2226_v19 = vld [vmem:[%s4248_s7 + $0x18] sm:$0xff]  ;;  %v2225_v42 = vld [vmem:[%s4248_s7 + $0x10] sm:$0xff]  ;;  %v2224_v8 = vld [vmem:[%s4248_s7 + $0x8] sm:$0xff] }
 0x7ed   :  { %v1996_v44 = vpop.f32.mrf.mxu0  ;;  %v2766_v49 = vpop.f32.mrf.mxu1 }
 0x7ee   :  { %v2433_v52 = vmul.f32 -1.442695, %v2044_v27  ;;  %v2045_v10 = vadd.f32 %v1996_v44, %v4301_v39  ;;  %v2223_v27 = vld [vmem:[%s4248_s7] sm:$0xff] }
 0x7ef   :  { %v1998_v54 = vpop.f32.mrf.mxu0  ;;  %v2040_v5 = vpop.f32.mrf.mxu1 }
 0x7f0   :  { %3050 = vpow2.f32 %v2433_v52  ;;  %v2046_v3 = vadd.f32 %v1998_v54, %v4300_v62  ;;  %v2434_v34 = vmul.f32 -1.442695, %v2045_v10  ;;  %v2073_v21 = vadd.f32 %v4160_v57, %v2040_v5  ;;  %v4305_v52 = vld [vmem:[#allocation23_spill] sm:$0xff] }
 0x7f1   :  { %v2767_v18 = vpop.f32.mrf.mxu1  ;;  %v2000_v13 = vpop.f32.mrf.mxu0  ;;  %v4306_v10 = vld [vmem:[#allocation27_spill] sm:$0xff] }
 0x7f2   :  { %v2435_v30 = vmul.f32 -1.442695, %v2046_v3  ;;  %v2047_v26 = vadd.f32 %v2000_v13, %v4302_v22  ;;  %v4307_v22 = vld [vmem:[#allocation25_spill] sm:$0xff] }
 0x7f4   :  { %3052 = vpow2.f32 %v2435_v30  ;;  %v2436_v37 = vmul.f32 -1.442695, %v2047_v26 }
 0x7f5   :  { %3054 = vpow2.f32 %v2434_v34 }
 0x7f6   :  { %3056 = vpow2.f32 %v2436_v37 }
 0x7fd   :  { %v3051_v15 = vpop.eup %3050 }
 0x7fe   :  { %v2060_v47 = vadd.f32 1.0, %v3051_v15  ;;  %v4308_v15 = vld [vmem:[#allocation29_spill] sm:$0xff] }
 0x800   :  { %3058 = vrcp.f32 %v2060_v47 }
 0x801   :  { %v3053_v51 = vpop.eup %3052 }
 0x802   :  { %v2062_v7 = vadd.f32 1.0, %v3053_v51  ;;  %v3055_v60 = vpop.eup %3054 }
 0x803   :  { %v3057_v0 = vpop.eup %3056  ;;  %v2061_v40 = vadd.f32 1.0, %v3055_v60 }
 0x804   :  { %3060 = vrcp.f32 %v2062_v7  ;;  %v2063_v6 = vadd.f32 1.0, %v3057_v0 }
 0x805   :  { %3062 = vrcp.f32 %v2061_v40 }
 0x806   :  { %3064 = vrcp.f32 %v2063_v6 }
 0x80d   :  { %v3059_v17 = vpop.eup %3058 }
 0x80e   :  { %v2074_v45 = vmul.f32 %v3059_v17, %v2072_v43 }
 0x810   :  { %v2076_v25 = vadd.f32 %v2074_v45, %v4303_v50 }
 0x811   :  { %v3061_v28 = vpop.eup %3060 }
 0x812   :  { %3066 = vtanh.f32 %v2076_v25  ;;  %v2075_v56 = vmul.f32 %v3061_v28, %v2073_v21  ;;  %v3063_v16 = vpop.eup %3062 }
 0x813   :  { %v3065_v38 = vpop.eup %3064  ;;  %v2080_v55 = vsub.f32 1.0, %v3063_v16  ;;  %v2084_v32 = vmul.f32 %v3063_v16, %v4113_v46  ;;  %v2232_v46 = vld [vmem:[%s4248_s7 + $0x48] sm:$0xff] }
 0x814   :  { %v2077_v2 = vadd.f32 %v2075_v56, %v4304_v14  ;;  %v2081_v12 = vsub.f32 1.0, %v3065_v38  ;;  %v2085_v4 = vmul.f32 %v3065_v38, %v4116_v23  ;;  %v2228_v23 = vld [vmem:[%s4248_s7 + $0x28] sm:$0xff]  ;;  %v4309_v56 = vld [vmem:[#allocation22_spill] sm:$0xff] }
 0x816   :  { %3068 = vtanh.f32 %v2077_v2 }
 0x81f   :  { %v3067_v63 = vpop.eup %3066 }
 0x820   :  { %v2082_v11 = vmul.f32 %v3067_v63, %v2080_v55  ;;  %v4310_v55 = vld [vmem:[#allocation26_spill] sm:$0xff] }
 0x822   :  { %v4167_v48 = vadd.f32 %v2084_v32, %v2082_v11 }
 0x823   :  { %v3069_v9 = vpop.eup %3068 }
 0x824   :  { %v2083_v29 = vmul.f32 %v3069_v9, %v2081_v12 }
 0x826   :  { %v4170_v20 = vadd.f32 %v2085_v4, %v2083_v29 }
 0x828   :  { %v2094_v24 = vpack.c.bf16 %v4170_v20, %v4167_v48 }
 0x82a   :  { %2128 = vmatmul.mubr.bf16.vlgmr.msra.gmra.mxu0 %v2094_v24  ;;  %2785 = vmatmul.mubr.bf16.vlgmr.msra.gmra.mxu1 %v2094_v24 }
 0x82b   :  { %2789 = vmatpush3.msra.mxu0 %v2238_v53 }
 0x82c   :  { %2790 = vmatprep.subr.mxu0 %v2237_v61 }
 0x82d   :  { %2791 = vmatpush3.msra.mxu0 %v2237_v61 }
 0x82e   :  { %2792 = vmatprep.subr.mxu0 %v2236_v1 }
 0x82f   :  { %2793 = vmatpush3.msra.mxu0 %v2236_v1 }
 0x830   :  { %2794 = vmatprep.subr.mxu0 %v2235_v33 }
 0x831   :  { %2795 = vmatpush3.msra.mxu0 %v2235_v33 }
 0x832   :  { %2796 = vmatprep.subr.mxu0 %v2234_v35 }
 0x833   :  { %2797 = vmatpush3.msra.mxu0 %v2234_v35  ;;  %v2441_v35 = vld [vmem:[%s4249_s8] ss:$0 sm:$0xff] }
 0x834   :  { %2798 = vmatprep.subr.mxu0 %v2233_v58 }
 0x835   :  { %2799 = vmatpush3.msra.mxu0 %v2233_v58 }
 0x836   :  { %2800 = vmatprep.subr.mxu0 %v2232_v46 }
 0x837   :  { %2801 = vmatpush3.msra.mxu0 %v2232_v46 }
 0x838   :  { %2802 = vmatprep.subr.mxu0 %v2231_v59 }
 0x839   :  { %2803 = vmatpush3.msra.mxu0 %v2231_v59 }
 0x83a   :  { %2804 = vmatprep.subr.mxu0 %v2230_v36 }
 0x83b   :  { %2805 = vmatpush3.msra.mxu0 %v2230_v36 }
 0x83c   :  { %2806 = vmatprep.subr.mxu0 %v2229_v41 }
 0x83d   :  { %2807 = vmatpush3.msra.mxu0 %v2229_v41 }
 0x83e   :  { %2808 = vmatprep.subr.mxu0 %v2228_v23 }
 0x83f   :  { %2809 = vmatpush3.msra.mxu0 %v2228_v23 }
 0x840   :  { %2810 = vmatprep.subr.mxu0 %v2227_v31 }
 0x841   :  { %2811 = vmatpush3.msra.mxu0 %v2227_v31 }
 0x842   :  { %2812 = vmatprep.subr.mxu0 %v2226_v19 }
 0x843   :  { %2813 = vmatpush3.msra.mxu0 %v2226_v19 }
 0x844   :  { %2814 = vmatprep.subr.mxu0 %v2225_v42 }
 0x845   :  { %2815 = vmatpush3.msra.mxu0 %v2225_v42 }
 0x846   :  { %2816 = vmatprep.subr.mxu0 %v2224_v8 }
 0x847   :  { %2817 = vmatpush3.msra.mxu0 %v2224_v8 }
 0x848   :  { %2818 = vmatprep.subr.mxu0 %v2223_v27 }
 0x849   :  { %2819 = vmatpush3.msra.mxu0 %v2223_v27 }
 0x8ea   :  { %v2129_v44 = vpop.f32.mrf.mxu0  ;;  %v2172_v49 = vpop.f32.mrf.mxu1 }
 0x8eb   :  { %v2179_v54 = vadd.f32 %v2129_v44, %v4305_v52  ;;  %v2207_v50 = vadd.f32 %v4160_v57, %v2172_v49 }
 0x8ec   :  { %v2131_v5 = vpop.f32.mrf.mxu0  ;;  %v2786_v62 = vpop.f32.mrf.mxu1 }
 0x8ed   :  { %v2437_v3 = vmul.f32 -1.442695, %v2179_v54  ;;  %v2180_v26 = vadd.f32 %v2131_v5, %v4307_v22 }
 0x8ee   :  { %v2133_v18 = vpop.f32.mrf.mxu0  ;;  %v2175_v39 = vpop.f32.mrf.mxu1 }
 0x8ef   :  { %3070 = vpow2.f32 %v2437_v3  ;;  %v2181_v30 = vadd.f32 %v2133_v18, %v4306_v10  ;;  %v2438_v51 = vmul.f32 -1.442695, %v2180_v26  ;;  %v2208_v2 = vadd.f32 %v4160_v57, %v2175_v39 }
 0x8f0   :  { %v2787_v13 = vpop.f32.mrf.mxu1  ;;  %v2135_v37 = vpop.f32.mrf.mxu0 }
 0x8f1   :  { %v2439_v34 = vmul.f32 -1.442695, %v2181_v30  ;;  %v2182_v47 = vadd.f32 %v2135_v37, %v4308_v15 }
 0x8f3   :  { %3072 = vpow2.f32 %v2439_v34  ;;  %v2440_v7 = vmul.f32 -1.442695, %v2182_v47 }
 0x8f4   :  { %3074 = vpow2.f32 %v2438_v51 }
 0x8f5   :  { %3076 = vpow2.f32 %v2440_v7 }
 0x8fc   :  { %v3071_v60 = vpop.eup %3070 }
 0x8fd   :  { %v2195_v0 = vadd.f32 1.0, %v3071_v60 }
 0x8ff   :  { %3078 = vrcp.f32 %v2195_v0 }
 0x900   :  { %v3073_v40 = vpop.eup %3072 }
 0x901   :  { %v2197_v43 = vadd.f32 1.0, %v3073_v40  ;;  %v3075_v17 = vpop.eup %3074 }
 0x902   :  { %v3077_v6 = vpop.eup %3076  ;;  %v2196_v45 = vadd.f32 1.0, %v3075_v17 }
 0x903   :  { %3080 = vrcp.f32 %v2197_v43  ;;  %v2198_v21 = vadd.f32 1.0, %v3077_v6 }
 0x904   :  { %3082 = vrcp.f32 %v2196_v45 }
 0x905   :  { %3084 = vrcp.f32 %v2198_v21 }
 0x90c   :  { %v3079_v25 = vpop.eup %3078 }
 0x90d   :  { %v2209_v28 = vmul.f32 %v3079_v25, %v2207_v50 }
 0x90f   :  { %v2211_v14 = vadd.f32 %v2209_v28, %v4309_v56 }
 0x910   :  { %v3081_v16 = vpop.eup %3080 }
 0x911   :  { %3086 = vtanh.f32 %v2211_v14  ;;  %v2210_v38 = vmul.f32 %v3081_v16, %v2208_v2  ;;  %v3083_v11 = vpop.eup %3082 }
 0x912   :  { %v3085_v32 = vpop.eup %3084  ;;  %v2215_v12 = vsub.f32 1.0, %v3083_v11  ;;  %v2219_v4 = vmul.f32 %v3083_v11, %v4167_v48 }
 0x913   :  { %v2212_v63 = vadd.f32 %v2210_v38, %v4310_v55  ;;  %v2216_v53 = vsub.f32 1.0, %v3085_v32  ;;  %v2220_v57 = vmul.f32 %v3085_v32, %v4170_v20 }
 0x915   :  { %3088 = vtanh.f32 %v2212_v63 }
 0x91e   :  { %v3087_v9 = vpop.eup %3086 }
 0x91f   :  { %v2217_v29 = vmul.f32 %v3087_v9, %v2215_v12 }
 0x921   :  { %v2221_v24 = vadd.f32 %v2219_v4, %v2217_v29 }
 0x922   :  { %v3089_v61 = vpop.eup %3088 }
 0x923   :  { %2820 = vmatprep.mubr.f32.mxu0 %v2221_v24  ;;  %v2218_v1 = vmul.f32 %v3089_v61, %v2216_v53 }
 0x925   :  { %v2222_v33 = vadd.f32 %v2220_v57, %v2218_v1 }
 0x927   :  { %2821 = vmatmul.mubr.f32.vlgmr.msra.gmra.mxu0 %v2222_v33 }
 0x9e7   :  { %v2822_v58 = vpop.f32.mrf.mxu0 }
 0x9e8   :  { %v2318_v46 = vadd.f32 %v2822_v58, %v2441_v35 }
 0x9e9   :  { %v2312_v59 = vpop.f32.mrf.mxu0 }
 0x9ea   :  { %2322 = vst [vmem:[%s4250_s9 + $0x8] sm:$0xff] %v2318_v46  ;;  %v2313_v48 = vadd.f32 %v2441_v35, %v2312_v59 }
 0x9ec   :  { %2321 = vst [vmem:[%s4250_s9] sm:$0xff] %v2313_v48 }

</bundles_post_ra>
